<compile_context>
chip_gen: v5e
topology: v5e:2x2
jax: 0.10.0
libtpu: 0.0.40
codegen_flags: <defaults>
</compile_context>

<pallas_src>
import jax
import jax.numpy as jnp
import numpy as np
from jax import lax
from jax.experimental import pallas as pl
from jax.experimental.pallas import tpu as pltpu


_SELU_ALPHA = 1.6732632423543772
_SELU_SCALE = 1.0507009873554804
_NEG_INF = -1e30


# --------------------------- activations (act(0) == 0 exactly) -----------------
def _selu(x):
    return _SELU_SCALE * jnp.where(x > 0, x, _SELU_ALPHA * (jnp.exp(x) - 1.0))


def _elu(x):
    return jnp.where(x > 0, x, jnp.exp(x) - 1.0)


def _relu(x):
    return jnp.maximum(x, 0.0)


def _round_up(x, m):
    return (x + m - 1) // m * m


# ------------------------------------ kernel -----------------------------------
def make_tps_kernel(meta):
    lanes = meta["lanes"]
    num_hidden = meta["num_hidden"]
    acts = meta["acts"]
    row_offs = meta["emb_row_offs"]          # python-int row offsets per categorical col
    n_cat = meta["n_cat"]
    emb_block = num_hidden + 1               # slab block holding the embedding tables

    def kernel(idx_ref, w_ref, b_ref, out_ref):
        tb = idx_ref.shape[0]
        idx = idx_ref[...]                                            # (tb, n_cat) int32

        # --- fused embedding gather: one-hot @ block-diagonal table matrix (MXU) ---
        lane = lax.broadcasted_iota(jnp.int32, (tb, lanes), 1)
        onehot = jnp.zeros((tb, lanes), jnp.float32)
        for j in range(n_cat):
            onehot = onehot + (lane == (idx[:, j:j + 1] + row_offs[j])).astype(jnp.float32)
        tbl = w_ref[emb_block * lanes:(emb_block + 1) * lanes, :]     # (lanes, lanes) bf16
        # cat = [e | 0 ... 0] lane-dense (tb, lanes) f32 running concat buffer.
        cat = jnp.dot(onehot.astype(jnp.bfloat16), tbl,
                      preferred_element_type=jnp.float32)

        # --- hidden layers: positioned weights -> cat += act(cat @ W + b) ----------
        for i in range(num_hidden):
            w = w_ref[i * lanes:(i + 1) * lanes, :]                   # (lanes, lanes) bf16
            b = b_ref[i:i + 1, :]                                     # (1, lanes) f32
            pre = jnp.dot(cat.astype(jnp.bfloat16), w,
                          preferred_element_type=jnp.float32) + b
            cat = cat + acts[i](pre)                                  # act(0)=0 keeps pads 0

        # --- output layer + lane-dense masked softmax ------------------------------
        wo = w_ref[num_hidden * lanes:(num_hidden + 1) * lanes, :]
        bo = b_ref[num_hidden:num_hidden + 1, :]                      # -1e30 on pad classes
        logits = jnp.dot(cat.astype(jnp.bfloat16), wo,
                         preferred_element_type=jnp.float32) + bo
        m = jnp.max(logits, axis=-1, keepdims=True)
        p = jnp.exp(logits - m)
        s = jnp.sum(p, axis=-1, keepdims=True)
        out_ref[...] = p / s            # exact divide: rows sum to 1 (approx recip did not)

    return kernel


# ------------------------------------ wrapper ----------------------------------
def tps_residual_forward(x_idx, params, *, batch_tile=1024):
    meta = params["meta"]
    lanes = meta["lanes"]
    num_class = meta["num_class"]
    n_cat = meta["n_cat"]

    batch = x_idx.shape[0]
    b8 = _round_up(batch, 8)
    n_steps = pl.cdiv(b8, batch_tile)
    if b8 >= 16:
        n_steps = max(n_steps, 2)        # keep both v7x TensorCores busy on small batches
    tb = min(batch_tile, _round_up(pl.cdiv(b8, n_steps), 8))
    pb = _round_up(batch, tb)

    idx = jnp.pad(x_idx.astype(jnp.int32), ((0, pb - batch), (0, 0)))   # pad rows use idx 0

    kernel = make_tps_kernel(meta)
    out = pl.pallas_call(
        kernel,
        out_shape=jax.ShapeDtypeStruct((pb, lanes), jnp.float32),
        grid=(pb // tb,),
        in_specs=[
            pl.BlockSpec((tb, n_cat), lambda i: (i, 0)),                # batch-tiled indices
            pl.BlockSpec(params["w_slab"].shape, lambda i: (0, 0)),     # resident bf16 slab
            pl.BlockSpec(params["b_slab"].shape, lambda i: (0, 0)),     # resident f32 biases
        ],
        out_specs=pl.BlockSpec((tb, lanes), lambda i: (i, 0)),
        compiler_params=pltpu.CompilerParams(
            dimension_semantics=("parallel",)),
    )(idx, params["w_slab"], params["b_slab"])

    return out[:batch, :num_class]


# ---------------------------- parameter construction ---------------------------
def init_params(key, emb_szs, linear_nodes=32, linear_out=16, num_class=9,
                num_block=3):
    n_emb = sum(nf for _, nf in emb_szs)
    n_cat = len(emb_szs)
    keys = iter(jax.random.split(key, 64))

    emb_tables = [0.5 * jax.random.normal(next(keys), (ni, nf), jnp.float32)
                  for ni, nf in emb_szs]

    def wn_linear(in_f, out_f):
        # weight_norm(nn.Linear): w = g * v / ||v||  (norm over input dim)
        v = jax.random.normal(next(keys), (out_f, in_f), jnp.float32) / jnp.sqrt(in_f)
        g = 1.0 + 0.1 * jax.random.normal(next(keys), (out_f,), jnp.float32)
        b = 0.1 * jax.random.normal(next(keys), (out_f,), jnp.float32)
        w_eff = g[:, None] * v / jnp.linalg.norm(v, axis=1, keepdims=True)
        return w_eff.T, b                    # (in, out) layout, bias (out,)

    # hidden layers: first linear + num_block residual blocks
    layer_ws, layer_bs = [], []
    w1, b1 = wn_linear(n_emb, linear_nodes)
    layer_ws.append(w1); layer_bs.append(b1)

    block_full = []
    for r in range(num_block):
        in_f = n_emb + (r + 1) * linear_nodes
        out_f = linear_out if r == num_block - 1 else linear_nodes
        w, b = wn_linear(in_f, out_f)
        layer_ws.append(w); layer_bs.append(b)
        block_full.append((w, b.reshape(1, out_f)))

    wo_v = jax.random.normal(next(keys), (num_class, linear_out), jnp.float32)
    wo = (wo_v / jnp.sqrt(linear_out)).T
    bo = 0.1 * jax.random.normal(next(keys), (num_class,), jnp.float32)

    # ---- pack everything into one lane-dense positioned slab (bf16) + f32 bias slab ----
    num_hidden = num_block + 1
    widths = [n_emb, linear_nodes] + [linear_nodes] * (num_block - 1) + [linear_out]
    offs = np.cumsum([0] + widths)           # lane offsets of [e | h1 | r0 | ... | r_last]
    cat_width = int(offs[-1])
    emb_rows = sum(ni for ni, _ in emb_szs)
    lanes = max(128, _round_up(max(cat_width, num_class, emb_rows), 128))
    assert cat_width <= lanes and num_class <= lanes
    # TODO(synk): very-high-cardinality tables (sum ni > lanes) need a DMA-gather path.
    assert emb_rows <= lanes

    n_blocks = num_hidden + 2                # hidden layers + output layer + embedding block
    wslab = np.zeros((n_blocks * lanes, lanes), np.float32)
    bslab = np.zeros((_round_up(num_hidden + 1, 8), lanes), np.float32)

    for i in range(num_hidden):
        w = np.asarray(layer_ws[i])          # (in_f, out_f)
        b = np.asarray(layer_bs[i])
        in_f, out_f = w.shape
        o = int(offs[i + 1])                 # output segment lane offset
        assert in_f == int(offs[i + 1]) and out_f == widths[i + 1]
        wslab[i * lanes: i * lanes + in_f, o:o + out_f] = w
        bslab[i, o:o + out_f] = b

    # output layer reads only the last residual segment
    r_off, r_w = int(offs[num_hidden]), widths[num_hidden]
    wslab[num_hidden * lanes + r_off: num_hidden * lanes + r_off + r_w,
          :num_class] = np.asarray(wo)
    bslab[num_hidden, :num_class] = np.asarray(bo)
    bslab[num_hidden, num_class:] = _NEG_INF      # mask pad classes (kept in f32)

    # embedding tables: block-diagonal one-hot-gather matrix in the last slab block
    eb = (num_hidden + 1) * lanes
    row_offs, r0, c0 = [], 0, 0
    for j, (ni, nf) in enumerate(emb_szs):
        row_offs.append(r0)
        wslab[eb + r0: eb + r0 + ni, c0:c0 + nf] = np.asarray(emb_tables[j])
        r0 += ni; c0 += nf

    acts = tuple([_selu] + [(_elu if r % 2 else _relu) for r in range(num_block)])

    return dict(
        emb_tables=emb_tables,
        w_slab=jnp.asarray(wslab, dtype=jnp.bfloat16),    # bf16 MXU operands
        b_slab=jnp.asarray(bslab, dtype=jnp.float32),     # biases / class mask stay f32
        meta=dict(lanes=lanes, n_emb=n_emb, num_class=num_class,
                  num_hidden=num_hidden, n_cat=n_cat,
                  emb_row_offs=tuple(row_offs), acts=acts),
        # pure-JAX f32 reference parameters
        w1=w1, b1=b1.reshape(1, -1), block_full=block_full,
        wo=wo, bo=bo.reshape(1, -1),
    )


# ------------------------------- pure-JAX reference ----------------------------
def ref_forward(x_idx, params):
    embs = [tbl[x_idx[:, i]] for i, tbl in enumerate(params["emb_tables"])]
    e = jnp.concatenate(embs, axis=1).astype(jnp.float32)
    h1 = _selu(e @ params["w1"] + params["b1"])
    ri = jnp.concatenate([e, h1], axis=1)
    nls = [(_elu if r % 2 else _relu) for r in range(len(params["block_full"]))]
    rx = None
    for r, (w, b) in enumerate(params["block_full"]):
        rx = nls[r](ri @ w + b)
        ri = jnp.concatenate([ri, rx], axis=1)
    logits = rx @ params["wo"] + params["bo"]
    return jax.nn.softmax(logits, axis=-1)


# -------------------------------------- main ------------------------------------
if __name__ == "__main__":
    key = jax.random.PRNGKey(0)
    emb_szs = [(10, 4), (8, 4), (6, 4), (12, 4)]   # n_emb = 16
    batch = 200                                    # exercises a 2-step grid + row padding

    kp, kx = jax.random.split(key)
    params = init_params(kp, emb_szs, linear_nodes=32, linear_out=16,
                         num_class=9, num_block=3)

    # integer categorical inputs, one column per embedding table
    cols = []
    for i, (ni, _) in enumerate(emb_szs):
        kx, kc = jax.random.split(kx)
        cols.append(jax.random.randint(kc, (batch,), 0, ni, dtype=jnp.int32))
    x_idx = jnp.stack(cols, axis=1)                # (batch, num_cat_features)

    out = jax.block_until_ready(tps_residual_forward(x_idx, params))
    ref = jax.block_until_ready(ref_forward(x_idx, params))

    assert out.shape == (batch, 9)
    # bf16 MXU operands (f32 accumulate) vs. the pure-f32 reference: allow bf16-level error.
    assert np.allclose(np.asarray(out), np.asarray(ref), rtol=3e-2, atol=3e-3), \
        "Pallas output mismatch vs JAX reference"
    # exact softmax division -> rows sum to 1 up to f32 rounding
    assert np.allclose(np.asarray(out).sum(axis=-1), 1.0, atol=1e-3), \
        "softmax rows do not sum to 1"

    print("KERNEL_OK")
</pallas_src>

<mosaic_0001>
module attributes {stable_mosaic.version = 11 : i64} {
  func.func @kernel(%arg0: i32, %arg1: memref<104x4xi32, #tpu.memory_space<vmem>>, %arg2: memref<768x128xbf16, #tpu.memory_space<vmem>>, %arg3: memref<8x128xf32, #tpu.memory_space<vmem>>, %arg4: memref<104x128xf32, #tpu.memory_space<vmem>>) attributes {dimension_semantics = [#tpu.dimension_semantics<parallel>], iteration_bounds = array<i64: 2>, scalar_prefetch = 0 : i64, scratch_operands = 0 : i64, tpu.core_type = #tpu.core_type<tc>, window_params = [{transform_indices = @transform_0, window_bounds = array<i64: 104, 4>}, {pipeline_mode = #tpu.pipeline_mode<synchronous>, transform_indices = @transform_1, window_bounds = array<i64: 768, 128>}, {pipeline_mode = #tpu.pipeline_mode<synchronous>, transform_indices = @transform_2, window_bounds = array<i64: 8, 128>}, {transform_indices = @transform_3, window_bounds = array<i64: 104, 128>}]} {
    %c0 = arith.constant 0 : index
    %c0_0 = arith.constant 0 : index
    %0 = vector.load %arg1[%c0, %c0_0] : memref<104x4xi32, #tpu.memory_space<vmem>>, vector<104x4xi32>
    %1 = tpu.iota {dimensions = array<i32: 1>} : vector<104x128xi32>
    %cst = arith.constant 0.000000e+00 : f32
    %2 = vector.broadcast %cst : f32 to vector<104x128xf32>
    %3 = vector.extract_strided_slice %0 {offsets = [0, 0], sizes = [104, 1], strides = [1, 1]} : vector<104x4xi32> to vector<104x1xi32>
    %c0_i32 = arith.constant 0 : i32
    %4 = vector.broadcast %c0_i32 : i32 to vector<104x1xi32>
    %5 = arith.addi %3, %4 : vector<104x1xi32>
    %6 = vector.broadcast %5 : vector<104x1xi32> to vector<104x128xi32>
    %7 = arith.cmpi eq, %1, %6 : vector<104x128xi32>
    %8 = arith.extui %7 : vector<104x128xi1> to vector<104x128xi32>
    %9 = arith.sitofp %8 : vector<104x128xi32> to vector<104x128xf32>
    %10 = arith.addf %2, %9 : vector<104x128xf32>
    %11 = vector.extract_strided_slice %0 {offsets = [0, 1], sizes = [104, 1], strides = [1, 1]} : vector<104x4xi32> to vector<104x1xi32>
    %c10_i32 = arith.constant 10 : i32
    %12 = vector.broadcast %c10_i32 : i32 to vector<104x1xi32>
    %13 = arith.addi %11, %12 : vector<104x1xi32>
    %14 = vector.broadcast %13 : vector<104x1xi32> to vector<104x128xi32>
    %15 = arith.cmpi eq, %1, %14 : vector<104x128xi32>
    %16 = arith.extui %15 : vector<104x128xi1> to vector<104x128xi32>
    %17 = arith.sitofp %16 : vector<104x128xi32> to vector<104x128xf32>
    %18 = arith.addf %10, %17 : vector<104x128xf32>
    %19 = vector.extract_strided_slice %0 {offsets = [0, 2], sizes = [104, 1], strides = [1, 1]} : vector<104x4xi32> to vector<104x1xi32>
    %c18_i32 = arith.constant 18 : i32
    %20 = vector.broadcast %c18_i32 : i32 to vector<104x1xi32>
    %21 = arith.addi %19, %20 : vector<104x1xi32>
    %22 = vector.broadcast %21 : vector<104x1xi32> to vector<104x128xi32>
    %23 = arith.cmpi eq, %1, %22 : vector<104x128xi32>
    %24 = arith.extui %23 : vector<104x128xi1> to vector<104x128xi32>
    %25 = arith.sitofp %24 : vector<104x128xi32> to vector<104x128xf32>
    %26 = arith.addf %18, %25 : vector<104x128xf32>
    %27 = vector.extract_strided_slice %0 {offsets = [0, 3], sizes = [104, 1], strides = [1, 1]} : vector<104x4xi32> to vector<104x1xi32>
    %c24_i32 = arith.constant 24 : i32
    %28 = vector.broadcast %c24_i32 : i32 to vector<104x1xi32>
    %29 = arith.addi %27, %28 : vector<104x1xi32>
    %30 = vector.broadcast %29 : vector<104x1xi32> to vector<104x128xi32>
    %31 = arith.cmpi eq, %1, %30 : vector<104x128xi32>
    %32 = arith.extui %31 : vector<104x128xi1> to vector<104x128xi32>
    %33 = arith.sitofp %32 : vector<104x128xi32> to vector<104x128xf32>
    %34 = arith.addf %26, %33 : vector<104x128xf32>
    %c640 = arith.constant 640 : index
    %c0_1 = arith.constant 0 : index
    %35 = vector.load %arg2[%c640, %c0_1] : memref<768x128xbf16, #tpu.memory_space<vmem>>, vector<128x128xbf16>
    %36 = arith.truncf %34 : vector<104x128xf32> to vector<104x128xbf16>
    %cst_2 = arith.constant dense<0.000000e+00> : vector<104x128xf32>
    %37 = tpu.matmul %36, %35, %cst_2 {dimension_numbers = #tpu.dot_dimension_numbers<[1], [0], [0], [1], [0, 0, 1, 1], [], []>} : vector<104x128xbf16>, vector<128x128xbf16>, vector<104x128xf32> -> vector<104x128xf32>
    %c0_3 = arith.constant 0 : index
    %c0_4 = arith.constant 0 : index
    %38 = vector.load %arg2[%c0_3, %c0_4] : memref<768x128xbf16, #tpu.memory_space<vmem>>, vector<128x128xbf16>
    %c0_5 = arith.constant 0 : index
    %c0_6 = arith.constant 0 : index
    %39 = vector.load %arg3[%c0_5, %c0_6] : memref<8x128xf32, #tpu.memory_space<vmem>>, vector<1x128xf32>
    %40 = arith.truncf %37 : vector<104x128xf32> to vector<104x128xbf16>
    %cst_7 = arith.constant dense<0.000000e+00> : vector<104x128xf32>
    %41 = tpu.matmul %40, %38, %cst_7 {dimension_numbers = #tpu.dot_dimension_numbers<[1], [0], [0], [1], [0, 0, 1, 1], [], []>} : vector<104x128xbf16>, vector<128x128xbf16>, vector<104x128xf32> -> vector<104x128xf32>
    %42 = vector.broadcast %39 : vector<1x128xf32> to vector<104x128xf32>
    %43 = arith.addf %41, %42 : vector<104x128xf32>
    %cst_8 = arith.constant 0.000000e+00 : f32
    %44 = vector.broadcast %cst_8 : f32 to vector<104x128xf32>
    %45 = arith.cmpf ogt, %43, %44 : vector<104x128xf32>
    %46 = math.exp %43 : vector<104x128xf32>
    %cst_9 = arith.constant 1.000000e+00 : f32
    %47 = vector.broadcast %cst_9 : f32 to vector<104x128xf32>
    %48 = arith.subf %46, %47 : vector<104x128xf32>
    %cst_10 = arith.constant 1.67326319 : f32
    %49 = vector.broadcast %cst_10 : f32 to vector<104x128xf32>
    %50 = arith.mulf %49, %48 : vector<104x128xf32>
    %51 = arith.select %45, %43, %50 : vector<104x128xi1>, vector<104x128xf32>
    %cst_11 = arith.constant 1.05070102 : f32
    %52 = vector.broadcast %cst_11 : f32 to vector<104x128xf32>
    %53 = arith.mulf %52, %51 : vector<104x128xf32>
    %54 = arith.addf %37, %53 : vector<104x128xf32>
    %c128 = arith.constant 128 : index
    %c0_12 = arith.constant 0 : index
    %55 = vector.load %arg2[%c128, %c0_12] : memref<768x128xbf16, #tpu.memory_space<vmem>>, vector<128x128xbf16>
    %c1 = arith.constant 1 : index
    %c0_13 = arith.constant 0 : index
    %56 = vector.load %arg3[%c1, %c0_13] : memref<8x128xf32, #tpu.memory_space<vmem>>, vector<1x128xf32>
    %57 = arith.truncf %54 : vector<104x128xf32> to vector<104x128xbf16>
    %cst_14 = arith.constant dense<0.000000e+00> : vector<104x128xf32>
    %58 = tpu.matmul %57, %55, %cst_14 {dimension_numbers = #tpu.dot_dimension_numbers<[1], [0], [0], [1], [0, 0, 1, 1], [], []>} : vector<104x128xbf16>, vector<128x128xbf16>, vector<104x128xf32> -> vector<104x128xf32>
    %59 = vector.broadcast %56 : vector<1x128xf32> to vector<104x128xf32>
    %60 = arith.addf %58, %59 : vector<104x128xf32>
    %cst_15 = arith.constant 0.000000e+00 : f32
    %61 = vector.broadcast %cst_15 : f32 to vector<104x128xf32>
    %62 = arith.maximumf %60, %61 : vector<104x128xf32>
    %63 = arith.addf %54, %62 : vector<104x128xf32>
    %c256 = arith.constant 256 : index
    %c0_16 = arith.constant 0 : index
    %64 = vector.load %arg2[%c256, %c0_16] : memref<768x128xbf16, #tpu.memory_space<vmem>>, vector<128x128xbf16>
    %c2 = arith.constant 2 : index
    %c0_17 = arith.constant 0 : index
    %65 = vector.load %arg3[%c2, %c0_17] : memref<8x128xf32, #tpu.memory_space<vmem>>, vector<1x128xf32>
    %66 = arith.truncf %63 : vector<104x128xf32> to vector<104x128xbf16>
    %cst_18 = arith.constant dense<0.000000e+00> : vector<104x128xf32>
    %67 = tpu.matmul %66, %64, %cst_18 {dimension_numbers = #tpu.dot_dimension_numbers<[1], [0], [0], [1], [0, 0, 1, 1], [], []>} : vector<104x128xbf16>, vector<128x128xbf16>, vector<104x128xf32> -> vector<104x128xf32>
    %68 = vector.broadcast %65 : vector<1x128xf32> to vector<104x128xf32>
    %69 = arith.addf %67, %68 : vector<104x128xf32>
    %cst_19 = arith.constant 0.000000e+00 : f32
    %70 = vector.broadcast %cst_19 : f32 to vector<104x128xf32>
    %71 = arith.cmpf ogt, %69, %70 : vector<104x128xf32>
    %72 = math.exp %69 : vector<104x128xf32>
    %cst_20 = arith.constant 1.000000e+00 : f32
    %73 = vector.broadcast %cst_20 : f32 to vector<104x128xf32>
    %74 = arith.subf %72, %73 : vector<104x128xf32>
    %75 = arith.select %71, %69, %74 : vector<104x128xi1>, vector<104x128xf32>
    %76 = arith.addf %63, %75 : vector<104x128xf32>
    %c384 = arith.constant 384 : index
    %c0_21 = arith.constant 0 : index
    %77 = vector.load %arg2[%c384, %c0_21] : memref<768x128xbf16, #tpu.memory_space<vmem>>, vector<128x128xbf16>
    %c3 = arith.constant 3 : index
    %c0_22 = arith.constant 0 : index
    %78 = vector.load %arg3[%c3, %c0_22] : memref<8x128xf32, #tpu.memory_space<vmem>>, vector<1x128xf32>
    %79 = arith.truncf %76 : vector<104x128xf32> to vector<104x128xbf16>
    %cst_23 = arith.constant dense<0.000000e+00> : vector<104x128xf32>
    %80 = tpu.matmul %79, %77, %cst_23 {dimension_numbers = #tpu.dot_dimension_numbers<[1], [0], [0], [1], [0, 0, 1, 1], [], []>} : vector<104x128xbf16>, vector<128x128xbf16>, vector<104x128xf32> -> vector<104x128xf32>
    %81 = vector.broadcast %78 : vector<1x128xf32> to vector<104x128xf32>
    %82 = arith.addf %80, %81 : vector<104x128xf32>
    %cst_24 = arith.constant 0.000000e+00 : f32
    %83 = vector.broadcast %cst_24 : f32 to vector<104x128xf32>
    %84 = arith.maximumf %82, %83 : vector<104x128xf32>
    %85 = arith.addf %76, %84 : vector<104x128xf32>
    %c512 = arith.constant 512 : index
    %c0_25 = arith.constant 0 : index
    %86 = vector.load %arg2[%c512, %c0_25] : memref<768x128xbf16, #tpu.memory_space<vmem>>, vector<128x128xbf16>
    %c4 = arith.constant 4 : index
    %c0_26 = arith.constant 0 : index
    %87 = vector.load %arg3[%c4, %c0_26] : memref<8x128xf32, #tpu.memory_space<vmem>>, vector<1x128xf32>
    %88 = arith.truncf %85 : vector<104x128xf32> to vector<104x128xbf16>
    %cst_27 = arith.constant dense<0.000000e+00> : vector<104x128xf32>
    %89 = tpu.matmul %88, %86, %cst_27 {dimension_numbers = #tpu.dot_dimension_numbers<[1], [0], [0], [1], [0, 0, 1, 1], [], []>} : vector<104x128xbf16>, vector<128x128xbf16>, vector<104x128xf32> -> vector<104x128xf32>
    %90 = vector.broadcast %87 : vector<1x128xf32> to vector<104x128xf32>
    %91 = arith.addf %89, %90 : vector<104x128xf32>
    %cst_28 = arith.constant dense<0xFF800000> : vector<104xf32>
    %92 = vector.multi_reduction <maximumf>, %91, %cst_28 [1] : vector<104x128xf32> to vector<104xf32>
    %93 = vector.shape_cast %92 : vector<104xf32> to vector<104x1xf32>
    %94 = vector.broadcast %93 : vector<104x1xf32> to vector<104x128xf32>
    %95 = arith.subf %91, %94 : vector<104x128xf32>
    %96 = math.exp %95 : vector<104x128xf32>
    %cst_29 = arith.constant dense<0.000000e+00> : vector<104xf32>
    %97 = vector.multi_reduction <add>, %96, %cst_29 [1] : vector<104x128xf32> to vector<104xf32>
    %98 = vector.shape_cast %97 : vector<104xf32> to vector<104x1xf32>
    %99 = vector.broadcast %98 : vector<104x1xf32> to vector<104x128xf32>
    %100 = arith.divf %96, %99 : vector<104x128xf32>
    %c0_30 = arith.constant 0 : index
    %c0_31 = arith.constant 0 : index
    %101 = vector.load %arg4[%c0_30, %c0_31] : memref<104x128xf32, #tpu.memory_space<vmem>>, vector<104x128xf32>
    tpu.vector_store %arg4[%c0_30, %c0_31], %100 {strides = array<i32>} : memref<104x128xf32, #tpu.memory_space<vmem>>, vector<104x128xf32>,
    return
  }
  func.func @transform_0(%arg0: i32) -> (i32, i32) {
    %c0_i32 = arith.constant 0 : i32
    %c0_i32_0 = arith.constant 0 : i32
    return %arg0, %c0_i32 : i32, i32
  }
  func.func @transform_1(%arg0: i32) -> (i32, i32) {
    %c0_i32 = arith.constant 0 : i32
    %c0_i32_0 = arith.constant 0 : i32
    %c0_i32_1 = arith.constant 0 : i32
    return %c0_i32, %c0_i32_0 : i32, i32
  }
  func.func @transform_2(%arg0: i32) -> (i32, i32) {
    %c0_i32 = arith.constant 0 : i32
    %c0_i32_0 = arith.constant 0 : i32
    %c0_i32_1 = arith.constant 0 : i32
    return %c0_i32, %c0_i32_0 : i32, i32
  }
  func.func @transform_3(%arg0: i32) -> (i32, i32) {
    %c0_i32 = arith.constant 0 : i32
    %c0_i32_0 = arith.constant 0 : i32
    return %arg0, %c0_i32 : i32, i32
  }
}

</mosaic_0001>

<bundles_post_ra>
// kernel: tpu_custom_call.1
= control target key start
LH: loop header
LB: loop body
LE: loop exit
PB: predicated region body
PF: predicated region fallthrough
CT: control target
= control target key end

     0   :  { %8 = vsyncpa [#allocation3], 0  ;;  %s3311_s0 = inlined_call_operand.vmem [shape: s32[208,4], index: 0, kind: input, shape index: {}]   ;;  %s3312_s1 = inlined_call_operand.hbm [shape: bf16[768,128], index: 1, kind: input, shape index: {}]   ;;  %s3313_s2 = inlined_call_operand.vmem [shape: f32[8,128], index: 2, kind: input, shape index: {}]   ;;  %s3314_s3 = inlined_call_operand.hbm [shape: f32[208,128], index: 3, kind: output, shape index: {}]  }
   0x1   :  { %9 = vsyncpa [#allocation4], 0 }
   0x2   :  { %11 = vsyncpa [#allocation4 + $0x1], 0  ;;  %s2609_s12 = smov 0   ;;  %s2611_s13 = smov 0  }
   0x3   :  { %s2613_s14 = smov 0   ;;  %s2615_s15 = smov 0  }
   0x4 LB: > { %s2630_s16 = sadd.s32 4294967295, %s2577_s15   ;;  %s1924_s17 = sadd.s32 4294967294, %s2577_s15   ;;  %s2577_s15 = sphi %s2615_s15, %s3320_s15   ;;  %s2573_s14 = sphi %s2613_s14, %s3319_s14   ;;  %s2569_s13 = sphi %s2611_s13, %s3318_s13   ;;  %s2565_s12 = sphi %s2609_s12, %s3317_s12  }
   0x5   : > { %s2634_s18 = sadd.s32 1, %s2577_s15   ;;  %s92_s19 = sadd.s32 1, %s2573_s14 }
   0x6   : > { %s89_s20 = ssub.s32 %s2577_s15, %s2634_s18  ;;  %p102_p0 = scmp.ne.s32.totalorder %s2573_s14, %s2569_s13 }
   0x7   : > { %p90_p1 = scmp.eq.s32.totalorder %s89_s20, 0  ;;  %p103_p2 = scmp.eq.s32.totalorder %s2630_s16, 1 }
   0x8   : > { %p108_p3 = scmp.ne.s32.totalorder %s2569_s13, %s2565_s12  ;;  %p109_p4 = scmp.eq.s32.totalorder %s1924_s17, 1 }
   0x9   : > { %s2645_s21 = scalar_select %p90_p1, %s2573_s14, %s92_s19  }
   0xa   : > { %p2647_p5 = por %p103_p2, %p102_p0  ;;  %p2651_p6 = por %p109_p4, %p108_p3 }
   0xb   : > { %p1925_p7 = scmp.ge.s32.totalorder %s2577_s15, 1  ;;  %p116_p8 = scmp.lt.s32.totalorder %s2577_s15, 3 }
   0xc   : > { %p2284_p9 = scmp.eq.s32.totalorder %s2630_s16, 0  ;;  %s127_s26 = sshll.u32 %s3312_s1, 4  ;;  %s128_s26 = int_to_ptr.hbm [resolvable:$true] %s127_s26 }
   0xd   : > { %p117_p10 = pnand %p1925_p7, %p116_p8  ;;  %s2579_s27 = smov [#allocation2]  }
   0xe   : > { %s129_s28 = sshll.u32 %s2579_s27, 4  ;;  %s2580_s29 = smov 64   ;;  %s130_s28 = int_to_ptr.vmem [resolvable:$true] %s129_s28 }
   0xf   : > { %p2276_p11 = pneg %p117_p10  ;;  %s2581_s30 = smov 4  }
  0x10   : > { %157 = sbr.rel (%p117_p10) target bundleno = 1476 (0x5c4), region = 32 }
  0x11   : > { %p2277_p12 = pnand %p2284_p9, %p2276_p11 }
  0x13   : > { %2279 = dma.hbm_to_vmem [thread:$0]  (!%p2277_p12), %s128_s26, 6144, %s130_s28, [#allocation3], %s2580_s29, %s2580_s29, %s2581_s30  }
  0x15   : > { %2556 = dma.done.wait (%p2284_p9), [#allocation3], 6144  }
  0x16   : > { %2558 = vsyncadd (%p2284_p9), [#allocation3], 4294961152  ;;  %s182_s4 = smul.u32 13, %s2630_s16  ;;  %v2582_v0 = vmov 3   ;;  %v2583_v1 = vmov 1   ;;  %v2584_v2 = vmov 2   ;;  %v202_v55 = vlaneseq }
  0x17   : > { %2331 = vset.pattern.permute.xlu0 %v2582_v0  ;;  %2329 = vset.pattern.permute.xlu1 %v2583_v1  ;;  %v2585_v10 = vmov 0   ;;  %v2211_v32 = vld [vmem:[#allocation2 + $0x178] sm:$0xff]  ;;  %v2210_v35 = vld [vmem:[#allocation2 + $0x170] sm:$0xff]  ;;  %v2209_v36 = vld [vmem:[#allocation2 + $0x168] sm:$0xff]  ;;  %s179_s28 = sand.u32 1, %s2569_s13   ;;  %s2531_s20 = scalar_lea.hbm %s3314_s3, 208 }
  0x18   : > { %p183_p13 = scmp.lt.s32.totalorder %s182_s4, 25  ;;  %2330 = vset.pattern.permute.xlu2 %v2584_v2  ;;  %678 = vmatpush.bf16.msra.mxu0 %v2211_v32  ;;  %v2208_v39 = vld [vmem:[#allocation2 + $0x160] sm:$0xff]  ;;  %v2207_v41 = vld [vmem:[#allocation2 + $0x158] sm:$0xff]  ;;  %v2206_v43 = vld [vmem:[#allocation2 + $0x150] sm:$0xff]  ;;  %v2742_v59 = vand.u32 127, %v202_v55  ;;  %s2269_s29 = smul.u32 104, %s179_s28 }
  0x19   : > { %2253 = vmatpush.bf16.msra.mxu2 %v2211_v32  ;;  %v2205_v44 = vld [vmem:[#allocation2 + $0x148] sm:$0xff]  ;;  %v2204_v48 = vld [vmem:[#allocation2 + $0x140] sm:$0xff]  ;;  %s1835_s9 = scalar_lea.sflag [#allocation4], %s179_s28 }
  0x1a   : > { %s3322_s4 = smov (!%p183_p13, %s182_s4), 25  ;;  %s3245_s30 = scalar_lea.vmem [#allocation5], %s2269_s29 }
  0x1b   : > { %s1930_s5 = sshll.u32 %s3322_s4, 3  ;;  %s2252_s4 = smul.u32 104, %s2630_s16 }
  0x1c   : > { %s2674_s8 = scalar_lea.vmem %s3311_s0, %s1930_s5  ;;  %679 = vmatpush.bf16.msra.mxu0 %v2210_v35  ;;  %s1847_s16 = sshll.u32 %s3245_s30, 4  ;;  %s1848_s16 = int_to_ptr.vmem [resolvable:$true] %s1847_s16 }
  0x1d   : > { %v189_v3 = vld [vmem:[%s2674_s8] sm:$0xff]  ;;  %v190_v7 = vld [vmem:[%s2674_s8 + $0x8] sm:$0xff]  ;;  %v191_v12 = vld [vmem:[%s2674_s8 + $0x10] sm:$0xff]  ;;  %2254 = vmatpush.bf16.msra.mxu2 %v2210_v35  ;;  %s1846_s7 = scalar_lea.hbm %s3314_s3, %s2252_s4 }
  0x1e   : > { %v503_v4 = vadd.s32 24, %v189_v3  ;;  %v295_v5 = vadd.s32 10, %v189_v3  ;;  %v399_v6 = vadd.s32 18, %v189_v3  ;;  %v296_v8 = vadd.s32 10, %v190_v7  ;;  %v193_v13 = vld [vmem:[%s2674_s8 + $0x20] sm:$0xff]  ;;  %v192_v14 = vld [vmem:[%s2674_s8 + $0x18] sm:$0xff] }
  0x1f   : > { %v400_v9 = vadd.s32 18, %v190_v7  ;;  %v504_v11 = vadd.s32 24, %v190_v7  ;;  %v297_v15 = vadd.s32 10, %v191_v12  ;;  %v298_v16 = vadd.s32 10, %v192_v14  ;;  %v2689_v19 = vld [vmem:[%s2674_s8 + $0x30] sm:$0xff]  ;;  %v194_v23 = vld [vmem:[%s2674_s8 + $0x28] sm:$0xff] }
  0x20   : > { %517 = vperm.xlu0 %2331, %v503_v4   ;;  %309 = vperm.xlu1 %2329, %v295_v5   ;;  %v401_v17 = vadd.s32 18, %v191_v12  ;;  %v402_v18 = vadd.s32 18, %v192_v14  ;;  %v301_v20 = vadd.s32 10, %v2689_v19  ;;  %v505_v21 = vadd.s32 24, %v191_v12  ;;  %v2702_v29 = vld [vmem:[%s2674_s8 + $0x40] sm:$0xff]  ;;  %v196_v33 = vld [vmem:[%s2674_s8 + $0x38] sm:$0xff] }
  0x21   : > { %413 = vperm.xlu2 %2330, %v399_v6   ;;  %v506_v22 = vadd.s32 24, %v192_v14  ;;  %v404_v24 = vadd.s32 18, %v194_v23  ;;  %v299_v25 = vadd.s32 10, %v193_v13  ;;  %v300_v26 = vadd.s32 10, %v194_v23  ;;  %v2712_v34 = vld [vmem:[%s2674_s8 + $0x48] sm:$0xff]  ;;  %680 = vmatpush.bf16.msra.mxu0 %v2209_v36  ;;  %v2731_v49 = vld [vmem:[%s2674_s8 + $0x58] sm:$0xff] }
  0x22   : > { %v403_v27 = vadd.s32 18, %v193_v13  ;;  %v507_v28 = vadd.s32 24, %v193_v13  ;;  %v407_v30 = vadd.s32 18, %v2702_v29  ;;  %v508_v31 = vadd.s32 24, %v194_v23  ;;  %2255 = vmatpush.bf16.msra.mxu2 %v2209_v36  ;;  %v199_v56 = vld [vmem:[%s2674_s8 + $0x50] sm:$0xff] }
  0x23   : > { %v302_v37 = vadd.s32 10, %v196_v33  ;;  %v405_v38 = vadd.s32 18, %v2689_v19  ;;  %v406_v42 = vadd.s32 18, %v196_v33  ;;  %v303_v45 = vadd.s32 10, %v2702_v29 }
  0x24   : > { %v304_v47 = vadd.s32 10, %v2712_v34  ;;  %v509_v50 = vadd.s32 24, %v2689_v19  ;;  %v510_v54 = vadd.s32 24, %v196_v33  ;;  %v513_v57 = vadd.s32 24, %v199_v56 }
  0x25   : > { %681 = vmatpush.bf16.msra.mxu0 %v2208_v39  ;;  %v408_v58 = vadd.s32 18, %v2712_v34  ;;  %v511_v61 = vadd.s32 24, %v2702_v29  ;;  %v2586_v4 = vmov 0.0   ;;  %v409_v32 = vadd.s32 18, %v199_v56 }
  0x26   : > { %2256 = vmatpush.bf16.msra.mxu2 %v2208_v39 }
  0x28   : > { %2332 = vset.pattern.permute.xlu0 %v2585_v10  ;;  %312 = vperm.xlu1 %2329, %v296_v8  }
  0x29   : > { %205 = vperm.xlu0 %2332, %v189_v3   ;;  %416 = vperm.xlu2 %2330, %v400_v9   ;;  %v2751_v3 = vld [vmem:[%s2674_s8 + $0x60] sm:$0xff]  ;;  %v512_v9 = vadd.s32 24, %v2712_v34  ;;  %s1849_s8 = sshll.u32 %s1846_s7, 4  ;;  %s1850_s8 = int_to_ptr.hbm [resolvable:$true] %s1849_s8 }
  0x2a   : > { %682 = vmatpush.bf16.msra.mxu0 %v2207_v41  ;;  %2257 = vmatpush.bf16.msra.mxu2 %v2207_v41  ;;  %v515_v6 = vadd.s32 24, %v2751_v3  ;;  %v307_v55 = vadd.s32 10, %v2751_v3  ;;  %s2525_s10 = sshra.s32 %s1850_s8, 4  ;;  %s2526_s10 = int_to_ptr.hbm [resolvable:$true] %s2525_s10 }
  0x2b   : > { %s2527_s11 = scalar_lea.hbm %s2526_s10, 104  ;;  %p2532_p3 = scmp.lt.s32.totalorder %s2526_s10, %s3314_s3 }
  0x2c   : > { %p2528_p0 = scmp.ne.s32.totalorder %s2526_s10, %s2527_s11  ;;  %p2533_p4 = scmp.lt.s32.totalorder %s2531_s20, %s2527_s11 }
  0x2e   : > { %683 = vmatpush.bf16.msra.mxu0 %v2206_v43  ;;  %2258 = vmatpush.bf16.msra.mxu2 %v2206_v43  ;;  %p2529_p1 = pnand %p2528_p0, %p2647_p5  ;;  %p2534_p7 = por %p2533_p4, %p2532_p3 }
  0x30   : > { %2333 = vset.pattern.permute.xlu1 %v2582_v0  ;;  %p2530_p2 = pneg %p2529_p1 }
  0x31   : > { %208 = vperm.xlu0 %2332, %v190_v7   ;;  %520 = vperm.xlu1 %2333, %v504_v11  }
  0x32   : > { %2334 = vset.pattern.permute.xlu2 %v2585_v10  ;;  %684 = vmatpush.bf16.msra.mxu0 %v2205_v44  ;;  %p2535_p8 = pnand %p2534_p7, %p2530_p2 }
  0x33   : > { %211 = vperm.xlu2 %2334, %v191_v12   ;;  %2259 = vmatpush.bf16.msra.mxu2 %v2205_v44 }
  0x36   : > { %685 = vmatpush.bf16.msra.mxu0 %v2204_v48 }
  0x37   : > { %2260 = vmatpush.bf16.msra.mxu2 %v2204_v48 }
  0x39   : > { %217 = vperm.xlu0 %2332, %v193_v13   ;;  %2335 = vset.pattern.permute.xlu1 %v2585_v10 }
  0x3a   : > { %214 = vperm.xlu1 %2335, %v192_v14  }
  0x3b   : > { %2336 = vset.pattern.permute.xlu2 %v2583_v1 }
  0x3c   : > { %315 = vperm.xlu2 %2336, %v297_v15  }
  0x41   : > { %2341 = vset.pattern.permute.xlu0 %v2583_v1 }
  0x42   : > { %318 = vperm.xlu0 %2341, %v298_v16   ;;  %2337 = vset.pattern.permute.xlu1 %v2584_v2 }
  0x43   : > { %419 = vperm.xlu1 %2337, %v401_v17  }
  0x44   : > { %2338 = vset.pattern.permute.xlu2 %v2584_v2 }
  0x45   : > { %422 = vperm.xlu2 %2338, %v402_v18  }
  0x4a   : > { %327 = vperm.xlu0 %2341, %v301_v20  }
  0x4b   : > { %2339 = vset.pattern.permute.xlu1 %v2582_v0 }
  0x4c   : > { %523 = vperm.xlu1 %2339, %v505_v21  }
  0x4d   : > { %2340 = vset.pattern.permute.xlu2 %v2582_v0 }
  0x4e   : > { %526 = vperm.xlu2 %2340, %v506_v22  }
  0x52   : > { %2350 = vset.pattern.permute.xlu0 %v2584_v2 }
  0x53   : > { %428 = vperm.xlu0 %2350, %v404_v24  }
  0x54   : > { %2342 = vset.pattern.permute.xlu1 %v2585_v10 }
  0x55   : > { %220 = vperm.xlu1 %2342, %v194_v23  }
  0x56   : > { %2343 = vset.pattern.permute.xlu2 %v2583_v1 }
  0x57   : > { %321 = vperm.xlu2 %2343, %v299_v25  }
  0x5b   : > { %437 = vperm.xlu0 %2350, %v407_v30  }
  0x5d   : > { %2344 = vset.pattern.permute.xlu1 %v2583_v1 }
  0x5e   : > { %324 = vperm.xlu1 %2344, %v300_v26   ;;  %v305_v26 = vadd.s32 10, %v199_v56 }
  0x5f   : > { %2345 = vset.pattern.permute.xlu2 %v2584_v2 }
  0x60   : > { %425 = vperm.xlu2 %2345, %v403_v27  }
  0x63   : > { %2359 = vset.pattern.permute.xlu0 %v2585_v10 }
  0x64   : > { %232 = vperm.xlu0 %2359, %v2712_v34   ;;  %v410_v34 = vadd.s32 18, %v2731_v49 }
  0x66   : > { %2346 = vset.pattern.permute.xlu1 %v2582_v0 }
  0x67   : > { %529 = vperm.xlu1 %2346, %v507_v28  }
  0x68   : > { %2347 = vset.pattern.permute.xlu2 %v2582_v0 }
  0x69   : > { %532 = vperm.xlu2 %2347, %v508_v31  }
  0x6c   : > { %238 = vperm.xlu0 %2359, %v2731_v49  }
  0x6f   : > { %2348 = vset.pattern.permute.xlu1 %v2585_v10 }
  0x70   : > { %223 = vperm.xlu1 %2348, %v2689_v19  }
  0x71   : > { %2349 = vset.pattern.permute.xlu2 %v2585_v10 }
  0x72   : > { %226 = vperm.xlu2 %2349, %v196_v33  }
  0x74   : > { %2367 = vset.pattern.permute.xlu0 %v2582_v0 }
  0x75   : > { %547 = vperm.xlu0 %2367, %v513_v57   ;;  %v411_v57 = vadd.s32 18, %v2751_v3 }
  0x78   : > { %2351 = vset.pattern.permute.xlu1 %v2583_v1 }
  0x79   : > { %330 = vperm.xlu1 %2351, %v302_v37  }
  0x7a   : > { %2352 = vset.pattern.permute.xlu2 %v2584_v2 }
  0x7b   : > { %431 = vperm.xlu2 %2352, %v405_v38   ;;  %v2719_v40 = vpop.permute.xlu2 %413 }
  0x7c   : > { %vm451_vm2 = vcmp.eq.s32.totalorder %v2742_v59, %v2719_v40 }
  0x7d   : > { %553 = vperm.xlu0 %2367, %v515_v6   ;;  %v1957_v13 = vsel %vm451_vm2, 1.0, %v2586_v4 }
  0x81   : > { %2353 = vset.pattern.permute.xlu1 %v2584_v2 }
  0x82   : > { %434 = vperm.xlu1 %2353, %v406_v42  }
  0x83   : > { %2354 = vset.pattern.permute.xlu2 %v2585_v10  ;;  %v2725_v46 = vpop.permute.xlu2 %416 }
  0x84   : > { %229 = vperm.xlu2 %2354, %v2702_v29   ;;  %vm452_vm5 = vcmp.eq.s32.totalorder %v2742_v59, %v2725_v46  ;;  %v306_v29 = vadd.s32 10, %v2731_v49 }
  0x85   : > { %v1958_v20 = vsel %vm452_vm5, 1.0, %v2586_v4 }
  0x8a   : > { %2355 = vset.pattern.permute.xlu1 %v2583_v1 }
  0x8b   : > { %333 = vperm.xlu1 %2355, %v303_v45   ;;  %v514_v45 = vadd.s32 24, %v2731_v49 }
  0x8c   : > { %2356 = vset.pattern.permute.xlu2 %v2583_v1 }
  0x8d   : > { %336 = vperm.xlu2 %2356, %v304_v47   ;;  %v2735_v51 = vpop.permute.xlu2 %211 }
  0x8e   : > { %vm245_vm10 = vcmp.eq.s32.totalorder %v2742_v59, %v2735_v51 }
  0x8f   : > { %v1933_v38 = vsel %vm245_vm10, 1.0, %v2586_v4 }
  0x92   : > { %v310_v52 = vpop.permute.xlu1 %309  ;;  %v518_v53 = vpop.permute.xlu0 %517 }
  0x93   : > { %2357 = vset.pattern.permute.xlu1 %v2582_v0  ;;  %vm347_vm1 = vcmp.eq.s32.totalorder %v2742_v59, %v310_v52  ;;  %vm555_vm4 = vcmp.eq.s32.totalorder %v2742_v59, %v518_v53 }
  0x94   : > { %535 = vperm.xlu1 %2357, %v509_v50   ;;  %v1944_v7 = vsel %vm347_vm1, 1.0, %v2586_v4  ;;  %v1970_v19 = vsel %vm555_vm4, 1.0, %v2586_v4 }
  0x95   : > { %2358 = vset.pattern.permute.xlu2 %v2582_v0 }
  0x96   : > { %538 = vperm.xlu2 %2358, %v510_v54   ;;  %v2747_v63 = vpop.permute.xlu2 %315 }
  0x97   : > { %vm349_vm11 = vcmp.eq.s32.totalorder %v2742_v59, %v2747_v63 }
  0x98   : > { %v1946_v39 = vsel %vm349_vm11, 1.0, %v2586_v4 }
  0x99   : > { %v388_v43 = vadd.f32 %v1946_v39, %v1933_v38 }
  0x9a   : > { %v313_v60 = vpop.permute.xlu1 %312 }
  0x9b   : > { %v206_v62 = vpop.permute.xlu0 %205  ;;  %vm348_vm3 = vcmp.eq.s32.totalorder %v2742_v59, %v313_v60 }
  0x9c   : > { %vm243_vm0 = vcmp.eq.s32.totalorder %v2742_v59, %v206_v62  ;;  %2360 = vset.pattern.permute.xlu1 %v2584_v2  ;;  %v1945_v14 = vsel %vm348_vm3, 1.0, %v2586_v4 }
  0x9d   : > { %440 = vperm.xlu1 %2360, %v408_v58   ;;  %v1931_v5 = vsel %vm243_vm0, 1.0, %v2586_v4 }
  0x9e   : > { %541 = vperm.xlu2 %2358, %v511_v61   ;;  %v386_v8 = vadd.f32 %v1944_v7, %v1931_v5 }
  0x9f   : > { %v423_v18 = vpop.permute.xlu2 %422 }
  0xa0   : > { %v490_v16 = vadd.f32 %v1957_v13, %v386_v8  ;;  %vm454_vm12 = vcmp.eq.s32.totalorder %v2742_v59, %v423_v18 }
  0xa1   : > { %v1960_v40 = vsel %vm454_vm12, 1.0, %v2586_v4 }
  0xa2   : > { %v594_v24 = vadd.f32 %v1970_v19, %v490_v16 }
  0xa3   : > { %v209_v11 = vpop.permute.xlu0 %208  ;;  %v521_v12 = vpop.permute.xlu1 %520 }
  0xa4   : > { %vm244_vm6 = vcmp.eq.s32.totalorder %v2742_v59, %v209_v11  ;;  %vm556_vm7 = vcmp.eq.s32.totalorder %v2742_v59, %v521_v12 }
  0xa5   : > { %v1932_v15 = vsel %vm244_vm6, 1.0, %v2586_v4  ;;  %2361 = vset.pattern.permute.xlu1 %v2582_v0  ;;  %v1971_v22 = vsel %vm556_vm7, 1.0, %v2586_v4 }
  0xa6   : > { %v387_v17 = vadd.f32 %v1945_v14, %v1932_v15  ;;  %544 = vperm.xlu1 %2361, %v512_v9   ;;  %2362 = vset.pattern.permute.xlu2 %v2585_v10 }
  0xa7   : > { %235 = vperm.xlu2 %2362, %v199_v56  }
  0xa8   : > { %v491_v21 = vadd.f32 %v1958_v20, %v387_v17  ;;  %v527_v30 = vpop.permute.xlu2 %526  ;;  %v2219_v20 = vld [vmem:[#allocation2 + $0x38] sm:$0xff] }
  0xa9   : > { %vm558_vm14 = vcmp.eq.s32.totalorder %v2742_v59, %v527_v30  ;;  %794 = vmatpush.bf16.msra.mxu1 %v2219_v20  ;;  %2261 = vmatpush.bf16.msra.mxu3 %v2219_v20 }
  0xaa   : > { %v595_v23 = vadd.f32 %v1971_v22, %v491_v21  ;;  %v1973_v46 = vsel %vm558_vm14, 1.0, %v2586_v4 }
  0xab   : > { %v2773_v25 = vpop.permute.xlu0 %217 }
  0xac   : > { %v215_v27 = vpop.permute.xlu1 %214  ;;  %v623_v28 = vpack.c.bf16 %v595_v23, %v594_v24  ;;  %vm247_vm0 = vcmp.eq.s32.totalorder %v2742_v59, %v2773_v25  ;;  %v2218_v23 = vld [vmem:[#allocation2 + $0x30] sm:$0xff]  ;;  %v2217_v24 = vld [vmem:[#allocation2 + $0x28] sm:$0xff] }
  0xad   : > { %vm246_vm8 = vcmp.eq.s32.totalorder %v2742_v59, %v215_v27  ;;  %795 = vmatpush.bf16.msra.mxu1 %v2218_v23  ;;  %2262 = vmatpush.bf16.msra.mxu3 %v2218_v23 }
  0xae   : > { %2363 = vset.pattern.permute.xlu1 %v2583_v1  ;;  %686 = vmatmul.bf16.vlgmr.msra.gmra.mxu0 %v623_v28  ;;  %v1934_v36 = vsel %vm246_vm8, 1.0, %v2586_v4 }
  0xaf   : > { %339 = vperm.xlu1 %2363, %v305_v26   ;;  %2364 = vset.pattern.permute.xlu2 %v2583_v1 }
  0xb0   : > { %342 = vperm.xlu2 %2364, %v306_v29  }
  0xb1   : > { %v322_v41 = vpop.permute.xlu2 %321  ;;  %796 = vmatpush.bf16.msra.mxu1 %v2217_v24  ;;  %2263 = vmatpush.bf16.msra.mxu3 %v2217_v24 }
  0xb2   : > { %vm351_vm1 = vcmp.eq.s32.totalorder %v2742_v59, %v322_v41 }
  0xb4   : > { %v319_v31 = vpop.permute.xlu0 %318 }
  0xb5   : > { %vm350_vm9 = vcmp.eq.s32.totalorder %v2742_v59, %v319_v31  ;;  %v420_v33 = vpop.permute.xlu1 %419  ;;  %v2216_v31 = vld [vmem:[#allocation2 + $0x20] sm:$0xff] }
  0xb6   : > { %v1947_v35 = vsel %vm350_vm9, 1.0, %v2586_v4  ;;  %vm453_vm13 = vcmp.eq.s32.totalorder %v2742_v59, %v420_v33  ;;  %797 = vmatpush.bf16.msra.mxu1 %v2216_v31  ;;  %2264 = vmatpush.bf16.msra.mxu3 %v2216_v31 }
  0xb7   : > { %2365 = vset.pattern.permute.xlu1 %v2584_v2  ;;  %v389_v37 = vadd.f32 %v1947_v35, %v1934_v36  ;;  %v1959_v42 = vsel %vm453_vm13, 1.0, %v2586_v4 }
  0xb8   : > { %443 = vperm.xlu1 %2365, %v409_v32   ;;  %2366 = vset.pattern.permute.xlu2 %v2584_v2  ;;  %v492_v48 = vadd.f32 %v1959_v42, %v388_v43 }
  0xb9   : > { %446 = vperm.xlu2 %2366, %v410_v34   ;;  %v493_v44 = vadd.f32 %v1960_v40, %v389_v37  ;;  %v2215_v37 = vld [vmem:[#allocation2 + $0x18] sm:$0xff] }
  0xba   : > { %v426_v54 = vpop.permute.xlu2 %425  ;;  %798 = vmatpush.bf16.msra.mxu1 %v2215_v37  ;;  %2265 = vmatpush.bf16.msra.mxu3 %v2215_v37 }
  0xbb   : > { %v597_v51 = vadd.f32 %v1973_v46, %v493_v44  ;;  %vm455_vm5 = vcmp.eq.s32.totalorder %v2742_v59, %v426_v54 }
  0xbc   : > { %v328_v49 = vpop.permute.xlu0 %327  ;;  %v1961_v5 = vsel %vm455_vm5, 1.0, %v2586_v4 }
  0xbd   : > { %vm353_vm8 = vcmp.eq.s32.totalorder %v2742_v59, %v328_v49 }
  0xbe   : > { %v524_v47 = vpop.permute.xlu1 %523  ;;  %v1950_v26 = vsel %vm353_vm8, 1.0, %v2586_v4 }
  0xbf   : > { %vm557_vm15 = vcmp.eq.s32.totalorder %v2742_v59, %v524_v47 }
  0xc0   : > { %v1972_v50 = vsel %vm557_vm15, 1.0, %v2586_v4  ;;  %2368 = vset.pattern.permute.xlu1 %v2582_v0 }
  0xc1   : > { %v596_v52 = vadd.f32 %v1972_v50, %v492_v48  ;;  %550 = vperm.xlu1 %2368, %v514_v45   ;;  %2369 = vset.pattern.permute.xlu2 %v2585_v10  ;;  %v2214_v45 = vld [vmem:[#allocation2 + $0x10] sm:$0xff]  ;;  %v2213_v48 = vld [vmem:[#allocation2 + $0x8] sm:$0xff] }
  0xc2   : > { %241 = vperm.xlu2 %2369, %v2751_v3   ;;  %799 = vmatpush.bf16.msra.mxu1 %v2214_v45 }
  0xc3   : > { %v624_v53 = vpack.c.bf16 %v597_v51, %v596_v52  ;;  %v533_v0 = vpop.permute.xlu2 %532  ;;  %2266 = vmatpush.bf16.msra.mxu3 %v2214_v45  ;;  %v2212_v52 = vld [vmem:[#allocation2] sm:$0xff] }
  0xc4   : > { %vm560_vm6 = vcmp.eq.s32.totalorder %v2742_v59, %v533_v0 }
  0xc5   : > { %691 = vmatmul.bf16.gmra.mxu0 %v624_v53  ;;  %v429_v58 = vpop.permute.xlu0 %428  ;;  %v1975_v8 = vsel %vm560_vm6, 1.0, %v2586_v4 }
  0xc6   : > { %vm456_vm4 = vcmp.eq.s32.totalorder %v2742_v59, %v429_v58  ;;  %800 = vmatpush.bf16.msra.mxu1 %v2213_v48 }
  0xc7   : > { %v221_v56 = vpop.permute.xlu1 %220  ;;  %v1962_v63 = vsel %vm456_vm4, 1.0, %v2586_v4  ;;  %2267 = vmatpush.bf16.msra.mxu3 %v2213_v48 }
  0xc8   : > { %vm248_vm2 = vcmp.eq.s32.totalorder %v2742_v59, %v221_v56 }
  0xc9   : > { %2370 = vset.pattern.permute.xlu1 %v2583_v1  ;;  %v1935_v1 = vsel %vm247_vm0, 1.0, %v2586_v4  ;;  %v1936_v61 = vsel %vm248_vm2, 1.0, %v2586_v4 }
  0xca   : > { %345 = vperm.xlu1 %2370, %v307_v55   ;;  %2371 = vset.pattern.permute.xlu2 %v2584_v2  ;;  %v1948_v2 = vsel %vm351_vm1, 1.0, %v2586_v4 }
  0xcb   : > { %449 = vperm.xlu2 %2371, %v411_v57   ;;  %v390_v3 = vadd.f32 %v1948_v2, %v1935_v1  ;;  %801 = vmatpush.bf16.msra.mxu1 %v2212_v52 }
  0xcc   : > { %v227_v7 = vpop.permute.xlu2 %226  ;;  %2268 = vmatpush.bf16.msra.mxu3 %v2212_v52 }
  0xcd   : > { %v494_v11 = vadd.f32 %v1961_v5, %v390_v3  ;;  %vm250_vm9 = vcmp.eq.s32.totalorder %v2742_v59, %v227_v7  ;;  %v438_v36 = vpop.permute.xlu0 %437 }
  0xce   : > { %v1938_v27 = vsel %vm250_vm9, 1.0, %v2586_v4 }
  0xd0   : > { %v325_v10 = vpop.permute.xlu1 %324 }
  0xd1   : > { %vm352_vm3 = vcmp.eq.s32.totalorder %v2742_v59, %v325_v10 }
  0xd2   : > { %v1949_v60 = vsel %vm352_vm3, 1.0, %v2586_v4  ;;  %vm459_vm3 = vcmp.eq.s32.totalorder %v2742_v59, %v438_v36 }
  0xd3   : > { %v391_v62 = vadd.f32 %v1949_v60, %v1936_v61  ;;  %v1965_v57 = vsel %vm459_vm3, 1.0, %v2586_v4 }
  0xd5   : > { %v495_v6 = vadd.f32 %v1962_v63, %v391_v62  ;;  %v432_v16 = vpop.permute.xlu2 %431 }
  0xd6   : > { %vm457_vm13 = vcmp.eq.s32.totalorder %v2742_v59, %v432_v16  ;;  %v233_v50 = vpop.permute.xlu0 %232 }
  0xd7   : > { %v599_v14 = vadd.f32 %v1975_v8, %v495_v6  ;;  %v1963_v35 = vsel %vm457_vm13, 1.0, %v2586_v4  ;;  %vm252_vm4 = vcmp.eq.s32.totalorder %v2742_v59, %v233_v50 }
  0xd8   : > { %v1940_v0 = vsel %vm252_vm4, 1.0, %v2586_v4 }
  0xd9   : > { %v530_v9 = vpop.permute.xlu1 %529 }
  0xda   : > { %vm559_vm7 = vcmp.eq.s32.totalorder %v2742_v59, %v530_v9 }
  0xdb   : > { %v1974_v12 = vsel %vm559_vm7, 1.0, %v2586_v4 }
  0xdc   : > { %v598_v13 = vadd.f32 %v1974_v12, %v494_v11 }
  0xde   : > { %v625_v15 = vpack.c.bf16 %v599_v14, %v598_v13  ;;  %v230_v19 = vpop.permute.xlu2 %229  ;;  %v239_v8 = vpop.permute.xlu0 %238 }
  0xdf   : > { %vm251_vm0 = vcmp.eq.s32.totalorder %v2742_v59, %v230_v19  ;;  %vm254_vm9 = vcmp.eq.s32.totalorder %v2742_v59, %v239_v8 }
  0xe0   : > { %696 = vmatmul.bf16.gmra.mxu0 %v625_v15  ;;  %v1939_v53 = vsel %vm251_vm0, 1.0, %v2586_v4  ;;  %v1942_v14 = vsel %vm254_vm9, 1.0, %v2586_v4 }
  0xe2   : > { %v224_v17 = vpop.permute.xlu1 %223 }
  0xe3   : > { %vm249_vm10 = vcmp.eq.s32.totalorder %v2742_v59, %v224_v17 }
  0xe4   : > { %v1937_v28 = vsel %vm249_vm10, 1.0, %v2586_v4 }
  0xe5   : > { %v392_v33 = vadd.f32 %v1950_v26, %v1937_v28 }
  0xe7   : > { %v2824_v22 = vpop.permute.xlu2 %336  ;;  %v496_v41 = vadd.f32 %v1963_v35, %v392_v33  ;;  %v548_v16 = vpop.permute.xlu0 %547 }
  0xe8   : > { %vm356_vm2 = vcmp.eq.s32.totalorder %v2742_v59, %v2824_v22 }
  0xe9   : > { %v1953_v56 = vsel %vm356_vm2, 1.0, %v2586_v4 }
  0xea   : > { %v395_v60 = vadd.f32 %v1953_v56, %v1940_v0  ;;  %v2221_v0 = vld [vmem:[#allocation2 + $0x48] sm:$0xff] }
  0xeb   : > { %v331_v18 = vpop.permute.xlu1 %330 }
  0xec   : > { %vm354_vm11 = vcmp.eq.s32.totalorder %v2742_v59, %v331_v18 }
  0xed   : > { %v1951_v29 = vsel %vm354_vm11, 1.0, %v2586_v4 }
  0xee   : > { %v393_v34 = vadd.f32 %v1951_v29, %v1938_v27 }
  0xef   : > { %v554_v36 = vpop.permute.xlu0 %553 }
  0xf0   : > { %v539_v30 = vpop.permute.xlu2 %538  ;;  %vm567_vm3 = vcmp.eq.s32.totalorder %v2742_v59, %v554_v36 }
  0xf1   : > { %vm562_vm14 = vcmp.eq.s32.totalorder %v2742_v59, %v539_v30 }
  0xf2   : > { %v1977_v39 = vsel %vm562_vm14, 1.0, %v2586_v4  ;;  %vm565_vm14 = vcmp.eq.s32.totalorder %v2742_v59, %v548_v16 }
  0xf3   : > { %v1980_v24 = vsel %vm565_vm14, 1.0, %v2586_v4 }
  0xf4   : > { %v435_v21 = vpop.permute.xlu1 %434 }
  0xf5   : > { %vm458_vm12 = vcmp.eq.s32.totalorder %v2742_v59, %v435_v21 }
  0xf6   : > { %v1964_v32 = vsel %vm458_vm12, 1.0, %v2586_v4 }
  0xf7   : > { %v497_v38 = vadd.f32 %v1964_v32, %v393_v34 }
  0xf8   : > { %v542_v46 = vpop.permute.xlu2 %541 }
  0xf9   : > { %v601_v43 = vadd.f32 %v1977_v39, %v497_v38  ;;  %vm563_vm6 = vcmp.eq.s32.totalorder %v2742_v59, %v542_v46 }
  0xfa   : > { %v1978_v1 = vsel %vm563_vm6, 1.0, %v2586_v4 }
  0xfd   : > { %v334_v25 = vpop.permute.xlu1 %333 }
  0xfe   : > { %vm355_vm1 = vcmp.eq.s32.totalorder %v2742_v59, %v334_v25 }
  0xff   : > { %v1952_v54 = vsel %vm355_vm1, 1.0, %v2586_v4 }
 0x100   : > { %v394_v55 = vadd.f32 %v1952_v54, %v1939_v53  ;;  %v2226_v53 = vld [vmem:[#allocation2 + $0x70] sm:$0xff]  ;;  %v2225_v54 = vld [vmem:[#allocation2 + $0x68] sm:$0xff] }
 0x101   : > { %v236_v49 = vpop.permute.xlu2 %235 }
 0x102   : > { %v498_v10 = vadd.f32 %v1965_v57, %v394_v55  ;;  %vm253_vm11 = vcmp.eq.s32.totalorder %v2742_v59, %v236_v49  ;;  %v2224_v49 = vld [vmem:[#allocation2 + $0x60] sm:$0xff]  ;;  %v2223_v55 = vld [vmem:[#allocation2 + $0x58] sm:$0xff]  ;;  %v2222_v57 = vld [vmem:[#allocation2 + $0x50] sm:$0xff] }
 0x103   : > { %v1941_v18 = vsel %vm253_vm11, 1.0, %v2586_v4 }
 0x104   : > { %v602_v63 = vadd.f32 %v1978_v1, %v498_v10  ;;  %v2916_v1 = vld [vmem:[%s3313_s2] ss:$0 sm:$0xff] }
 0x106   : > { %v536_v40 = vpop.permute.xlu1 %535 }
 0x107   : > { %vm561_vm15 = vcmp.eq.s32.totalorder %v2742_v59, %v536_v40 }
 0x108   : > { %v1976_v42 = vsel %vm561_vm15, 1.0, %v2586_v4 }
 0x109   : > { %v600_v44 = vadd.f32 %v1976_v42, %v496_v41  ;;  %v1982_v42 = vsel %vm567_vm3, 1.0, %v2586_v4 }
 0x10a   : > { %v343_v5 = vpop.permute.xlu2 %342 }
 0x10b   : > { %v626_v47 = vpack.c.bf16 %v601_v43, %v600_v44  ;;  %vm358_vm8 = vcmp.eq.s32.totalorder %v2742_v59, %v343_v5 }
 0x10c   : > { %v1955_v13 = vsel %vm358_vm8, 1.0, %v2586_v4 }
 0x10d   : > { %701 = vmatmul.bf16.gmra.mxu0 %v626_v47  ;;  %v397_v20 = vadd.f32 %v1955_v13, %v1942_v14 }
 0x10f   : > { %v441_v51 = vpop.permute.xlu1 %440 }
 0x110   : > { %vm460_vm5 = vcmp.eq.s32.totalorder %v2742_v59, %v441_v51 }
 0x111   : > { %v1966_v58 = vsel %vm460_vm5, 1.0, %v2586_v4 }
 0x112   : > { %v499_v61 = vadd.f32 %v1966_v58, %v395_v60  ;;  %v2220_v60 = vld [vmem:[#allocation2 + $0x40] sm:$0xff] }
 0x113   : > { %v447_v9 = vpop.permute.xlu2 %446 }
 0x114   : > { %vm462_vm13 = vcmp.eq.s32.totalorder %v2742_v59, %v447_v9 }
 0x115   : > { %v1968_v22 = vsel %vm462_vm13, 1.0, %v2586_v4 }
 0x116   : > { %v501_v27 = vadd.f32 %v1968_v22, %v397_v20 }
 0x118   : > { %v545_v2 = vpop.permute.xlu1 %544 }
 0x119   : > { %vm564_vm7 = vcmp.eq.s32.totalorder %v2742_v59, %v545_v2 }
 0x11a   : > { %v1979_v62 = vsel %vm564_vm7, 1.0, %v2586_v4 }
 0x11b   : > { %v603_v3 = vadd.f32 %v1979_v62, %v499_v61 }
 0x11c   : > { %v242_v17 = vpop.permute.xlu2 %241 }
 0x11d   : > { %v627_v6 = vpack.c.bf16 %v603_v3, %v602_v63  ;;  %vm255_vm0 = vcmp.eq.s32.totalorder %v2742_v59, %v242_v17 }
 0x11e   : > { %v1943_v34 = vsel %vm255_vm0, 1.0, %v2586_v4 }
 0x11f   : > { %706 = vmatmul.bf16.vlgmr.msra.gmra.mxu2 %v627_v6 }
 0x121   : > { %v340_v7 = vpop.permute.xlu1 %339 }
 0x122   : > { %vm357_vm10 = vcmp.eq.s32.totalorder %v2742_v59, %v340_v7 }
 0x123   : > { %v1954_v15 = vsel %vm357_vm10, 1.0, %v2586_v4 }
 0x124   : > { %v396_v21 = vadd.f32 %v1954_v15, %v1941_v18 }
 0x125   : > { %v450_v33 = vpop.permute.xlu2 %449 }
 0x126   : > { %vm463_vm1 = vcmp.eq.s32.totalorder %v2742_v59, %v450_v33 }
 0x127   : > { %v1969_v38 = vsel %vm463_vm1, 1.0, %v2586_v4 }
 0x12a   : > { %v444_v11 = vpop.permute.xlu1 %443 }
 0x12b   : > { %v2862_v12 = vpop.f32.mrf.mxu0  ;;  %vm461_vm12 = vcmp.eq.s32.totalorder %v2742_v59, %v444_v11 }
 0x12c   : > { %v1967_v19 = vsel %vm461_vm12, 1.0, %v2586_v4 }
 0x12d   : > { %v500_v23 = vadd.f32 %v1967_v19, %v396_v21 }
 0x12f   : > { %v604_v30 = vadd.f32 %v1980_v24, %v500_v23 }
 0x133   : > { %v2875_v25 = vpop.f32.mrf.mxu0  ;;  %v551_v26 = vpop.permute.xlu1 %550 }
 0x134   : > { %vm566_vm15 = vcmp.eq.s32.totalorder %v2742_v59, %v551_v26  ;;  %v738_v28 = vpack.c.bf16 %v2875_v25, %v2862_v12 }
 0x135   : > { %v1981_v29 = vsel %vm566_vm15, 1.0, %v2586_v4 }
 0x136   : > { %v605_v31 = vadd.f32 %v1981_v29, %v501_v27  ;;  %802 = vmatmul.bf16.vlgmr.msra.gmra.mxu1 %v738_v28 }
 0x138   : > { %v628_v32 = vpack.c.bf16 %v605_v31, %v604_v30 }
 0x13a   : > { %711 = vmatmul.bf16.gmra.mxu2 %v628_v32 }
 0x13c   : > { %v346_v35 = vpop.permute.xlu1 %345 }
 0x13d   : > { %vm359_vm2 = vcmp.eq.s32.totalorder %v2742_v59, %v346_v35 }
 0x13e   : > { %v1956_v37 = vsel %vm359_vm2, 1.0, %v2586_v4  ;;  %v2227_v4 = vld [vmem:[#allocation2 + $0x78] sm:$0xff] }
 0x13f   : > { %v398_v39 = vadd.f32 %v1956_v37, %v1943_v34  ;;  %1014 = vmatpush.bf16.msrb.mxu2 %v2227_v4 }
 0x141   : > { %v502_v40 = vadd.f32 %v1969_v38, %v398_v39 }
 0x142   : > { %v2888_v41 = vpop.f32.mrf.mxu0 }
 0x143   : > { %v606_v43 = vadd.f32 %v1982_v42, %v502_v40  ;;  %1015 = vmatpush.bf16.msrb.mxu2 %v2226_v53 }
 0x145   : > { %v629_v44 = vpack.c.bf16 %v606_v43, %v606_v43 }
 0x147   : > { %1016 = vmatpush.bf16.msrb.mxu2 %v2225_v54 }
 0x14a   : > { %v2891_v45 = vpop.f32.mrf.mxu0  ;;  %716 = vmatmul.bf16.gmra.mxu2 %v629_v44 }
 0x14b   : > { %v739_v46 = vpack.c.bf16 %v2891_v45, %v2888_v41  ;;  %1017 = vmatpush.bf16.msrb.mxu2 %v2224_v49 }
 0x14d   : > { %807 = vmatmul.bf16.gmra.mxu1 %v739_v46 }
 0x14f   : > { %1018 = vmatpush.bf16.msrb.mxu2 %v2223_v55 }
 0x153   : > { %1019 = vmatpush.bf16.msrb.mxu2 %v2222_v57 }
 0x157   : > { %1020 = vmatpush.bf16.msrb.mxu2 %v2221_v0 }
 0x15b   : > { %1021 = vmatpush.bf16.msrb.mxu2 %v2220_v60 }
 0x15d   : > { %v2895_v47 = vpop.f32.mrf.mxu0 }
 0x165   : > { %v2897_v48 = vpop.f32.mrf.mxu0 }
 0x166   : > { %v740_v59 = vpack.c.bf16 %v2897_v48, %v2895_v47 }
 0x168   : > { %812 = vmatmul.bf16.gmra.mxu1 %v740_v59 }
 0x18a   : > { %v2901_v50 = vpop.f32.mrf.mxu0 }
 0x192   : > { %v2903_v51 = vpop.f32.mrf.mxu0 }
 0x193   : > { %v741_v52 = vpack.c.bf16 %v2903_v51, %v2901_v50 }
 0x195   : > { %817 = vmatmul.bf16.gmra.mxu1 %v741_v52 }
 0x1a2   : > { %v2907_v56 = vpop.f32.mrf.mxu2 }
 0x1aa   : > { %v2909_v58 = vpop.f32.mrf.mxu2 }
 0x1ab   : > { %v742_v10 = vpack.c.bf16 %v2909_v58, %v2907_v56 }
 0x1ad   : > { %822 = vmatmul.bf16.vlgmr.msra.gmra.mxu3 %v742_v10 }
 0x1b3   : > { %v803_v2 = vpop.f32.mrf.mxu1 }
 0x1b4   : > { %v804_v61 = vadd.f32 %v2916_v1, %v803_v2 }
 0x1b6   : > { %v850_v62 = vmul.f32 1.442695, %v804_v61  ;;  %vm837_vm4 = vcmp.gt.f32.partialorder %v804_v61, 0.0 }
 0x1b8   : > { %2377 = vpow2.f32 %v850_v62 }
 0x1bb   : > { %v805_v63 = vpop.f32.mrf.mxu1 }
 0x1bc   : > { %v806_v3 = vadd.f32 %v2916_v1, %v805_v63 }
 0x1bd   : > { %v2920_v5 = vpop.f32.mrf.mxu2 }
 0x1be   : > { %v2378_v6 = vpop.eup %2377  ;;  %v852_v7 = vmul.f32 1.442695, %v806_v3  ;;  %vm838_vm5 = vcmp.gt.f32.partialorder %v806_v3, 0.0 }
 0x1bf   : > { %v2047_v8 = vadd.f32 -1.0, %v2378_v6 }
 0x1c0   : > { %2379 = vpow2.f32 %v852_v7 }
 0x1c1   : > { %v889_v9 = vmul.f32 1.6732632, %v2047_v8 }
 0x1c3   : > { %v902_v15 = vsel %vm837_vm4, %v804_v61, %v889_v9 }
 0x1c4   : > { %v915_v18 = vmul.f32 1.050701, %v902_v15 }
 0x1c5   : > { %v2922_v11 = vpop.f32.mrf.mxu2 }
 0x1c6   : > { %v2380_v13 = vpop.eup %2379  ;;  %v743_v14 = vpack.c.bf16 %v2922_v11, %v2920_v5  ;;  %v2930_v26 = vadd.f32 %v915_v18, %v2862_v12 }
 0x1c7   : > { %v2048_v16 = vadd.f32 -1.0, %v2380_v13 }
 0x1c8   : > { %827 = vmatmul.bf16.gmra.mxu3 %v743_v14 }
 0x1c9   : > { %v890_v17 = vmul.f32 1.6732632, %v2048_v16 }
 0x1ca   : > { %v808_v19 = vpop.f32.mrf.mxu1 }
 0x1cb   : > { %v903_v20 = vsel %vm838_vm5, %v806_v3, %v890_v17  ;;  %v809_v21 = vadd.f32 %v2916_v1, %v808_v19 }
 0x1cc   : > { %v916_v22 = vmul.f32 1.050701, %v903_v20 }
 0x1cd   : > { %v854_v23 = vmul.f32 1.442695, %v809_v21  ;;  %v2927_v24 = vpop.f32.mrf.mxu2  ;;  %vm839_vm6 = vcmp.gt.f32.partialorder %v809_v21, 0.0 }
 0x1ce   : > { %v2933_v27 = vadd.f32 %v916_v22, %v2875_v25  ;;  %v744_v35 = vpack.c.bf16 %v2927_v24, %v2927_v24 }
 0x1cf   : > { %2381 = vpow2.f32 %v854_v23  ;;  %v2234_v23 = vld [vmem:[#allocation2 + $0xb0] sm:$0xff] }
 0x1d0   : > { %v958_v28 = vpack.c.bf16 %v2933_v27, %v2930_v26 }
 0x1d2   : > { %v810_v29 = vpop.f32.mrf.mxu1  ;;  %1022 = vmatmul.bf16.vlgmr.msrb.gmra.mxu2 %v958_v28 }
 0x1d3   : > { %v811_v30 = vadd.f32 %v2916_v1, %v810_v29 }
 0x1d5   : > { %v2382_v31 = vpop.eup %2381  ;;  %v856_v32 = vmul.f32 1.442695, %v811_v30  ;;  %v719_v33 = vpop.f32.mrf.mxu2  ;;  %vm840_vm7 = vcmp.gt.f32.partialorder %v811_v30, 0.0 }
 0x1d6   : > { %v2049_v34 = vadd.f32 -1.0, %v2382_v31 }
 0x1d7   : > { %2383 = vpow2.f32 %v856_v32  ;;  %v2233_v32 = vld [vmem:[#allocation2 + $0xa8] sm:$0xff] }
 0x1d8   : > { %832 = vmatmul.bf16.gmra.mxu3 %v744_v35  ;;  %v891_v12 = vmul.f32 1.6732632, %v2049_v34 }
 0x1da   : > { %v904_v36 = vsel %vm839_vm6, %v809_v21, %v891_v12  ;;  %v2232_v12 = vld [vmem:[#allocation2 + $0xa0] sm:$0xff] }
 0x1db   : > { %v917_v39 = vmul.f32 1.050701, %v904_v36  ;;  %v2231_v36 = vld [vmem:[#allocation2 + $0x98] sm:$0xff] }
 0x1dd   : > { %v2384_v25 = vpop.eup %2383  ;;  %v2941_v44 = vadd.f32 %v917_v39, %v2888_v41 }
 0x1de   : > { %v2050_v37 = vadd.f32 -1.0, %v2384_v25 }
 0x1e0   : > { %v892_v38 = vmul.f32 1.6732632, %v2050_v37 }
 0x1e2   : > { %v905_v40 = vsel %vm840_vm7, %v811_v30, %v892_v38 }
 0x1e3   : > { %v918_v42 = vmul.f32 1.050701, %v905_v40 }
 0x1e5   : > { %v813_v43 = vpop.f32.mrf.mxu1  ;;  %v2944_v46 = vadd.f32 %v918_v42, %v2891_v45  ;;  %v2229_v42 = vld [vmem:[#allocation2 + $0x88] sm:$0xff] }
 0x1e6   : > { %v814_v59 = vadd.f32 %v2916_v1, %v813_v43 }
 0x1e7   : > { %v959_v4 = vpack.c.bf16 %v2944_v46, %v2941_v44 }
 0x1e8   : > { %v858_v52 = vmul.f32 1.442695, %v814_v59  ;;  %vm841_vm8 = vcmp.gt.f32.partialorder %v814_v59, 0.0 }
 0x1e9   : > { %1027 = vmatmul.bf16.gmra.mxu2 %v959_v4 }
 0x1ea   : > { %2385 = vpow2.f32 %v858_v52 }
 0x1ed   : > { %v815_v53 = vpop.f32.mrf.mxu1 }
 0x1ee   : > { %v816_v54 = vadd.f32 %v2916_v1, %v815_v53 }
 0x1f0   : > { %v2386_v49 = vpop.eup %2385  ;;  %v860_v55 = vmul.f32 1.442695, %v816_v54  ;;  %vm842_vm9 = vcmp.gt.f32.partialorder %v816_v54, 0.0 }
 0x1f1   : > { %v2051_v57 = vadd.f32 -1.0, %v2386_v49 }
 0x1f2   : > { %2387 = vpow2.f32 %v860_v55 }
 0x1f3   : > { %v893_v41 = vmul.f32 1.6732632, %v2051_v57 }
 0x1f5   : > { %v906_v45 = vsel %vm841_vm8, %v814_v59, %v893_v41  ;;  %v2228_v59 = vld [vmem:[#allocation2 + $0x80] sm:$0xff] }
 0x1f6   : > { %v919_v2 = vmul.f32 1.050701, %v906_v45 }
 0x1f8   : > { %v2388_v0 = vpop.eup %2387  ;;  %v2951_v63 = vadd.f32 %v919_v2, %v2895_v47 }
 0x1f9   : > { %v2052_v10 = vadd.f32 -1.0, %v2388_v0 }
 0x1fb   : > { %v894_v60 = vmul.f32 1.6732632, %v2052_v10 }
 0x1fd   : > { %v907_v61 = vsel %vm842_vm9, %v816_v54, %v894_v60 }
 0x1fe   : > { %v920_v62 = vmul.f32 1.050701, %v907_v61 }
 0x200   : > { %v2954_v3 = vadd.f32 %v920_v62, %v2897_v48  ;;  %v2235_v48 = vld [vmem:[#allocation2 + $0xb8] sm:$0xff] }
 0x201   : > { %1156 = vmatpush.bf16.msrb.mxu3 %v2235_v48 }
 0x202   : > { %v960_v6 = vpack.c.bf16 %v2954_v3, %v2951_v63 }
 0x204   : > { %1032 = vmatmul.bf16.gmra.mxu2 %v960_v6 }
 0x205   : > { %1157 = vmatpush.bf16.msrb.mxu3 %v2234_v23 }
 0x209   : > { %1158 = vmatpush.bf16.msrb.mxu3 %v2233_v32 }
 0x20d   : > { %1159 = vmatpush.bf16.msrb.mxu3 %v2232_v12 }
 0x211   : > { %1160 = vmatpush.bf16.msrb.mxu3 %v2231_v36 }
 0x212   : > { %v818_v7 = vpop.f32.mrf.mxu1 }
 0x213   : > { %v819_v8 = vadd.f32 %v2916_v1, %v818_v7 }
 0x215   : > { %v862_v9 = vmul.f32 1.442695, %v819_v8  ;;  %vm843_vm10 = vcmp.gt.f32.partialorder %v819_v8, 0.0 }
 0x217   : > { %2389 = vpow2.f32 %v862_v9 }
 0x21a   : > { %v820_v13 = vpop.f32.mrf.mxu1 }
 0x21b   : > { %v821_v14 = vadd.f32 %v2916_v1, %v820_v13 }
 0x21d   : > { %v2390_v15 = vpop.eup %2389  ;;  %v864_v16 = vmul.f32 1.442695, %v821_v14  ;;  %vm844_vm11 = vcmp.gt.f32.partialorder %v821_v14, 0.0 }
 0x21e   : > { %v2053_v17 = vadd.f32 -1.0, %v2390_v15 }
 0x21f   : > { %2391 = vpow2.f32 %v864_v16 }
 0x220   : > { %v895_v47 = vmul.f32 1.6732632, %v2053_v17 }
 0x222   : > { %v908_v19 = vsel %vm843_vm10, %v819_v8, %v895_v47 }
 0x223   : > { %v921_v22 = vmul.f32 1.050701, %v908_v19 }
 0x225   : > { %v2392_v18 = vpop.eup %2391  ;;  %v2961_v30 = vadd.f32 %v921_v22, %v2901_v50 }
 0x226   : > { %v2054_v20 = vadd.f32 -1.0, %v2392_v18 }
 0x228   : > { %v896_v21 = vmul.f32 1.6732632, %v2054_v20 }
 0x22a   : > { %v909_v28 = vsel %vm844_vm11, %v821_v14, %v896_v21 }
 0x22b   : > { %v922_v29 = vmul.f32 1.050701, %v909_v28 }
 0x22d   : > { %v2964_v31 = vadd.f32 %v922_v29, %v2903_v51  ;;  %v2230_v51 = vld [vmem:[#allocation2 + $0x90] sm:$0xff] }
 0x22e   : > { %1161 = vmatpush.bf16.msrb.mxu3 %v2230_v51 }
 0x22f   : > { %v961_v33 = vpack.c.bf16 %v2964_v31, %v2961_v30 }
 0x230   : > { %v823_v34 = vpop.f32.mrf.mxu3 }
 0x231   : > { %v824_v35 = vadd.f32 %v2916_v1, %v823_v34  ;;  %1037 = vmatmul.bf16.gmra.mxu2 %v961_v33 }
 0x232   : > { %1162 = vmatpush.bf16.msrb.mxu3 %v2229_v42 }
 0x233   : > { %v866_v25 = vmul.f32 1.442695, %v824_v35  ;;  %vm845_vm12 = vcmp.gt.f32.partialorder %v824_v35, 0.0 }
 0x235   : > { %2393 = vpow2.f32 %v866_v25 }
 0x236   : > { %1163 = vmatpush.bf16.msrb.mxu3 %v2228_v59 }
 0x238   : > { %v825_v50 = vpop.f32.mrf.mxu3 }
 0x239   : > { %v826_v37 = vadd.f32 %v2916_v1, %v825_v50 }
 0x23b   : > { %v2394_v38 = vpop.eup %2393  ;;  %v868_v39 = vmul.f32 1.442695, %v826_v37  ;;  %vm846_vm13 = vcmp.gt.f32.partialorder %v826_v37, 0.0 }
 0x23c   : > { %v2055_v40 = vadd.f32 -1.0, %v2394_v38 }
 0x23d   : > { %2395 = vpow2.f32 %v868_v39 }
 0x23e   : > { %v897_v43 = vmul.f32 1.6732632, %v2055_v40 }
 0x240   : > { %v910_v52 = vsel %vm845_vm12, %v824_v35, %v897_v43 }
 0x241   : > { %v923_v49 = vmul.f32 1.050701, %v910_v52 }
 0x243   : > { %v2396_v4 = vpop.eup %2395  ;;  %v2971_v0 = vadd.f32 %v923_v49, %v2907_v56  ;;  %v2983_v56 = vld [vmem:[%s3313_s2 + $0x1] ss:$0 sm:$0xff] }
 0x244   : > { %v2056_v53 = vadd.f32 -1.0, %v2396_v4 }
 0x246   : > { %v898_v54 = vmul.f32 1.6732632, %v2056_v53 }
 0x248   : > { %v911_v55 = vsel %vm846_vm13, %v826_v37, %v898_v54 }
 0x249   : > { %v924_v57 = vmul.f32 1.050701, %v911_v55 }
 0x24b   : > { %v828_v41 = vpop.f32.mrf.mxu3  ;;  %v2974_v45 = vadd.f32 %v924_v57, %v2909_v58 }
 0x24c   : > { %v829_v10 = vadd.f32 %v2916_v1, %v828_v41 }
 0x24d   : > { %v962_v60 = vpack.c.bf16 %v2974_v45, %v2971_v0 }
 0x24e   : > { %v870_v2 = vmul.f32 1.442695, %v829_v10  ;;  %vm847_vm14 = vcmp.gt.f32.partialorder %v829_v10, 0.0 }
 0x24f   : > { %1042 = vmatmul.bf16.gmra.mxu2 %v962_v60 }
 0x250   : > { %2397 = vpow2.f32 %v870_v2 }
 0x253   : > { %v830_v61 = vpop.f32.mrf.mxu3 }
 0x254   : > { %v831_v62 = vadd.f32 %v2916_v1, %v830_v61 }
 0x255   : > { %v1023_v6 = vpop.f32.mrf.mxu2 }
 0x256   : > { %v2398_v7 = vpop.eup %2397  ;;  %v872_v8 = vmul.f32 1.442695, %v831_v62  ;;  %v1024_v9 = vadd.f32 %v2983_v56, %v1023_v6  ;;  %vm848_vm15 = vcmp.gt.f32.partialorder %v831_v62, 0.0 }
 0x257   : > { %v2057_v58 = vadd.f32 -1.0, %v2398_v7 }
 0x258   : > { %2399 = vpow2.f32 %v872_v8  ;;  %v1057_v47 = vmax.f32 %v1024_v9, 0.0  ;;  %v2243_v8 = vld [vmem:[#allocation2 + $0xf8] sm:$0xff]  ;;  %v2241_v9 = vld [vmem:[#allocation2 + $0xe8] sm:$0xff] }
 0x259   : > { %v899_v13 = vmul.f32 1.6732632, %v2057_v58  ;;  %1350 = vmatpush.bf16.msrb.mxu0 %v2243_v8  ;;  %v2242_v58 = vld [vmem:[#allocation2 + $0xf0] sm:$0xff] }
 0x25a   : > { %v2989_v28 = vadd.f32 %v1057_v47, %v2930_v26 }
 0x25b   : > { %v833_v14 = vpop.f32.mrf.mxu3  ;;  %v912_v19 = vsel %vm847_vm14, %v829_v10, %v899_v13  ;;  %v2240_v13 = vld [vmem:[#allocation2 + $0xe0] sm:$0xff] }
 0x25c   : > { %v834_v15 = vadd.f32 %v2916_v1, %v833_v14  ;;  %v925_v23 = vmul.f32 1.050701, %v912_v19 }
 0x25d   : > { %v1025_v16 = vpop.f32.mrf.mxu2  ;;  %1351 = vmatpush.bf16.msrb.mxu0 %v2242_v58 }
 0x25e   : > { %v2400_v17 = vpop.eup %2399  ;;  %v874_v18 = vmul.f32 1.442695, %v834_v15  ;;  %v1026_v48 = vadd.f32 %v2983_v56, %v1025_v16  ;;  %v2997_v12 = vadd.f32 %v925_v23, %v2920_v5  ;;  %vm849_vm0 = vcmp.gt.f32.partialorder %v834_v15, 0.0  ;;  %v2238_v16 = vld [vmem:[#allocation2 + $0xd0] sm:$0xff]  ;;  %v3052_v23 = vld [vmem:[%s3313_s2 + $0x2] ss:$0 sm:$0xff] }
 0x25f   : > { %v2058_v20 = vadd.f32 -1.0, %v2400_v17 }
 0x260   : > { %2401 = vpow2.f32 %v874_v18  ;;  %v1058_v21 = vmax.f32 %v1026_v48, 0.0  ;;  %v2237_v18 = vld [vmem:[#allocation2 + $0xc8] sm:$0xff] }
 0x261   : > { %v900_v22 = vmul.f32 1.6732632, %v2058_v20  ;;  %1352 = vmatpush.bf16.msrb.mxu0 %v2241_v9 }
 0x262   : > { %v2992_v29 = vadd.f32 %v1058_v21, %v2933_v27  ;;  %v2236_v21 = vld [vmem:[#allocation2 + $0xc0] sm:$0xff] }
 0x263   : > { %v913_v1 = vsel %vm848_vm15, %v831_v62, %v900_v22  ;;  %v835_v32 = vpop.f32.mrf.mxu3 }
 0x264   : > { %v926_v33 = vmul.f32 1.050701, %v913_v1  ;;  %v1100_v34 = vpack.c.bf16 %v2992_v29, %v2989_v28 }
 0x265   : > { %1353 = vmatpush.bf16.msrb.mxu0 %v2240_v13 }
 0x266   : > { %v2402_v35 = vpop.eup %2401  ;;  %1164 = vmatmul.bf16.vlgmr.msrb.gmra.mxu3 %v1100_v34  ;;  %v3000_v25 = vadd.f32 %v926_v33, %v2922_v11 }
 0x267   : > { %v2059_v36 = vadd.f32 -1.0, %v2402_v35 }
 0x268   : > { %v963_v26 = vpack.c.bf16 %v3000_v25, %v2997_v12 }
 0x269   : > { %v901_v27 = vmul.f32 1.6732632, %v2059_v36 }
 0x26a   : > { %1047 = vmatmul.bf16.gmra.mxu2 %v963_v26 }
 0x26b   : > { %v914_v37 = vsel %vm849_vm0, %v834_v15, %v901_v27  ;;  %v2239_v15 = vld [vmem:[#allocation2 + $0xd8] sm:$0xff] }
 0x26c   : > { %v1028_v50 = vpop.f32.mrf.mxu2  ;;  %v927_v51 = vmul.f32 1.050701, %v914_v37  ;;  %1354 = vmatpush.bf16.msrb.mxu0 %v2239_v15 }
 0x26d   : > { %v1029_v38 = vadd.f32 %v2983_v56, %v1028_v50 }
 0x26e   : > { %v3006_v40 = vadd.f32 %v927_v51, %v2927_v24 }
 0x26f   : > { %v1059_v5 = vmax.f32 %v1029_v38, 0.0 }
 0x270   : > { %v964_v43 = vpack.c.bf16 %v3006_v40, %v3006_v40  ;;  %1355 = vmatpush.bf16.msrb.mxu0 %v2238_v16 }
 0x271   : > { %v3012_v59 = vadd.f32 %v1059_v5, %v2941_v44 }
 0x274   : > { %v1030_v39 = vpop.f32.mrf.mxu2  ;;  %1356 = vmatpush.bf16.msrb.mxu0 %v2237_v18 }
 0x275   : > { %v1031_v11 = vadd.f32 %v2983_v56, %v1030_v39 }
 0x277   : > { %v1060_v42 = vmax.f32 %v1031_v11, 0.0 }
 0x278   : > { %1357 = vmatpush.bf16.msrb.mxu0 %v2236_v21 }
 0x279   : > { %v3015_v4 = vadd.f32 %v1060_v42, %v2944_v46 }
 0x27a   : > { %1052 = vmatmul.bf16.gmra.mxu2 %v964_v43 }
 0x27b   : > { %v1101_v52 = vpack.c.bf16 %v3015_v4, %v3012_v59 }
 0x27d   : > { %1169 = vmatmul.bf16.gmra.mxu3 %v1101_v52 }
 0x287   : > { %v1033_v24 = vpop.f32.mrf.mxu2 }
 0x288   : > { %v1034_v53 = vadd.f32 %v2983_v56, %v1033_v24 }
 0x28a   : > { %v1061_v49 = vmax.f32 %v1034_v53, 0.0 }
 0x28c   : > { %v3022_v41 = vadd.f32 %v1061_v49, %v2951_v63 }
 0x28f   : > { %v1035_v54 = vpop.f32.mrf.mxu2 }
 0x290   : > { %v1036_v55 = vadd.f32 %v2983_v56, %v1035_v54 }
 0x292   : > { %v1062_v57 = vmax.f32 %v1036_v55, 0.0 }
 0x294   : > { %v3025_v44 = vadd.f32 %v1062_v57, %v2954_v3 }
 0x296   : > { %v1102_v46 = vpack.c.bf16 %v3025_v44, %v3022_v41 }
 0x298   : > { %1174 = vmatmul.bf16.gmra.mxu3 %v1102_v46 }
 0x2b4   : > { %v1038_v10 = vpop.f32.mrf.mxu2 }
 0x2b5   : > { %v1039_v60 = vadd.f32 %v2983_v56, %v1038_v10 }
 0x2b7   : > { %v1063_v61 = vmax.f32 %v1039_v60, 0.0 }
 0x2b9   : > { %v3032_v7 = vadd.f32 %v1063_v61, %v2961_v30 }
 0x2bc   : > { %v1040_v2 = vpop.f32.mrf.mxu2 }
 0x2bd   : > { %v1041_v62 = vadd.f32 %v2983_v56, %v1040_v2 }
 0x2bf   : > { %v1064_v6 = vmax.f32 %v1041_v62, 0.0 }
 0x2c1   : > { %v3035_v63 = vadd.f32 %v1064_v6, %v2964_v31 }
 0x2c3   : > { %v1103_v3 = vpack.c.bf16 %v3035_v63, %v3032_v7 }
 0x2c5   : > { %1179 = vmatmul.bf16.gmra.mxu3 %v1103_v3 }
 0x2d2   : > { %v1043_v14 = vpop.f32.mrf.mxu2 }
 0x2d3   : > { %v1044_v30 = vadd.f32 %v2983_v56, %v1043_v14 }
 0x2d5   : > { %v1065_v17 = vmax.f32 %v1044_v30, 0.0 }
 0x2d7   : > { %v3042_v19 = vadd.f32 %v1065_v17, %v2971_v0 }
 0x2da   : > { %v1045_v31 = vpop.f32.mrf.mxu2 }
 0x2db   : > { %v1046_v47 = vadd.f32 %v2983_v56, %v1045_v31 }
 0x2dd   : > { %v1066_v48 = vmax.f32 %v1046_v47, 0.0 }
 0x2df   : > { %v3045_v20 = vadd.f32 %v1066_v48, %v2974_v45 }
 0x2e1   : > { %v1104_v22 = vpack.c.bf16 %v3045_v20, %v3042_v19 }
 0x2e3   : > { %1184 = vmatmul.bf16.gmra.mxu3 %v1104_v22 }
 0x2e9   : > { %v1165_v1 = vpop.f32.mrf.mxu3 }
 0x2ea   : > { %v1166_v32 = vadd.f32 %v3052_v23, %v1165_v1 }
 0x2ec   : > { %v1212_v33 = vmul.f32 1.442695, %v1166_v32  ;;  %vm1199_vm1 = vcmp.gt.f32.partialorder %v1166_v32, 0.0 }
 0x2ed   : > { %v1048_v0 = vpop.f32.mrf.mxu2 }
 0x2ee   : > { %2403 = vpow2.f32 %v1212_v33  ;;  %v1049_v45 = vadd.f32 %v2983_v56, %v1048_v0 }
 0x2f0   : > { %v1067_v50 = vmax.f32 %v1049_v45, 0.0 }
 0x2f1   : > { %v1167_v34 = vpop.f32.mrf.mxu3 }
 0x2f2   : > { %v1168_v35 = vadd.f32 %v3052_v23, %v1167_v34  ;;  %v3059_v39 = vadd.f32 %v1067_v50, %v2997_v12  ;;  %v2250_v50 = vld [vmem:[#allocation2 + $0x130] sm:$0xff] }
 0x2f4   : > { %v1214_v36 = vmul.f32 1.442695, %v1168_v35  ;;  %v2404_v27 = vpop.eup %2403  ;;  %vm1200_vm2 = vcmp.gt.f32.partialorder %v1168_v35, 0.0 }
 0x2f5   : > { %v1050_v26 = vpop.f32.mrf.mxu2  ;;  %v2124_v38 = vadd.f32 -1.0, %v2404_v27 }
 0x2f6   : > { %2405 = vpow2.f32 %v1214_v36  ;;  %v1051_v37 = vadd.f32 %v2983_v56, %v1050_v26  ;;  %v2251_v26 = vld [vmem:[#allocation2 + $0x138] sm:$0xff] }
 0x2f7   : > { %v1251_v43 = vsel %vm1199_vm1, %v1166_v32, %v2124_v38  ;;  %1492 = vmatpush.bf16.msrb.mxu1 %v2251_v26  ;;  %v2248_v38 = vld [vmem:[#allocation2 + $0x120] sm:$0xff] }
 0x2f8   : > { %v1068_v51 = vmax.f32 %v1051_v37, 0.0  ;;  %v3068_v12 = vadd.f32 %v1251_v43, %v2989_v28  ;;  %v2249_v37 = vld [vmem:[#allocation2 + $0x128] sm:$0xff] }
 0x2fa   : > { %v3062_v5 = vadd.f32 %v1068_v51, %v3000_v25 }
 0x2fb   : > { %1493 = vmatpush.bf16.msrb.mxu1 %v2250_v50 }
 0x2fc   : > { %v2406_v11 = vpop.eup %2405  ;;  %v1105_v42 = vpack.c.bf16 %v3062_v5, %v3059_v39 }
 0x2fd   : > { %v2125_v52 = vadd.f32 -1.0, %v2406_v11  ;;  %v1053_v24 = vpop.f32.mrf.mxu2 }
 0x2fe   : > { %1189 = vmatmul.bf16.gmra.mxu3 %v1105_v42  ;;  %v1054_v54 = vadd.f32 %v2983_v56, %v1053_v24 }
 0x2ff   : > { %v1252_v53 = vsel %vm1200_vm2, %v1168_v35, %v2125_v52  ;;  %1494 = vmatpush.bf16.msrb.mxu1 %v2249_v37 }
 0x300   : > { %v1170_v49 = vpop.f32.mrf.mxu3  ;;  %v3071_v25 = vadd.f32 %v1252_v53, %v2992_v29  ;;  %v1069_v10 = vmax.f32 %v1054_v54, 0.0  ;;  %v2247_v54 = vld [vmem:[#allocation2 + $0x118] sm:$0xff] }
 0x301   : > { %v1171_v55 = vadd.f32 %v3052_v23, %v1170_v49  ;;  %v2246_v49 = vld [vmem:[#allocation2 + $0x110] sm:$0xff] }
 0x302   : > { %v1294_v57 = vpack.c.bf16 %v3071_v25, %v3068_v12  ;;  %v3077_v2 = vadd.f32 %v1069_v10, %v3006_v40  ;;  %v2245_v10 = vld [vmem:[#allocation2 + $0x108] sm:$0xff] }
 0x303   : > { %v1216_v46 = vmul.f32 1.442695, %v1171_v55  ;;  %vm1201_vm3 = vcmp.gt.f32.partialorder %v1171_v55, 0.0  ;;  %1495 = vmatpush.bf16.msrb.mxu1 %v2248_v38 }
 0x304   : > { %1358 = vmatmul.bf16.vlgmr.msrb.gmra.mxu0 %v1294_v57  ;;  %v1106_v29 = vpack.c.bf16 %v3077_v2, %v3077_v2 }
 0x305   : > { %v1055_v60 = vpop.f32.mrf.mxu2  ;;  %2407 = vpow2.f32 %v1216_v46 }
 0x307   : > { %1496 = vmatpush.bf16.msrb.mxu1 %v2247_v54 }
 0x308   : > { %v1172_v56 = vpop.f32.mrf.mxu3 }
 0x309   : > { %v1173_v28 = vadd.f32 %v3052_v23, %v1172_v56 }
 0x30b   : > { %v1218_v61 = vmul.f32 1.442695, %v1173_v28  ;;  %v2408_v62 = vpop.eup %2407  ;;  %vm1202_vm4 = vcmp.gt.f32.partialorder %v1173_v28, 0.0  ;;  %1497 = vmatpush.bf16.msrb.mxu1 %v2246_v49 }
 0x30c   : > { %v2126_v6 = vadd.f32 -1.0, %v2408_v62 }
 0x30d   : > { %2409 = vpow2.f32 %v1218_v61 }
 0x30e   : > { %1194 = vmatmul.bf16.gmra.mxu3 %v1106_v29  ;;  %v1253_v58 = vsel %vm1201_vm3, %v1171_v55, %v2126_v6 }
 0x30f   : > { %v3083_v40 = vadd.f32 %v1253_v58, %v3012_v59  ;;  %1498 = vmatpush.bf16.msrb.mxu1 %v2245_v10 }
 0x313   : > { %v2410_v3 = vpop.eup %2409 }
 0x314   : > { %v2127_v8 = vadd.f32 -1.0, %v2410_v3 }
 0x316   : > { %v1254_v9 = vsel %vm1202_vm4, %v1173_v28, %v2127_v8 }
 0x317   : > { %v3086_v13 = vadd.f32 %v1254_v9, %v3015_v4 }
 0x319   : > { %v1295_v14 = vpack.c.bf16 %v3086_v13, %v3083_v40 }
 0x31b   : > { %v1175_v15 = vpop.f32.mrf.mxu3  ;;  %1363 = vmatmul.bf16.gmra.mxu0 %v1295_v14 }
 0x31c   : > { %v1176_v30 = vadd.f32 %v3052_v23, %v1175_v15 }
 0x31e   : > { %v1220_v16 = vmul.f32 1.442695, %v1176_v30  ;;  %vm1203_vm5 = vcmp.gt.f32.partialorder %v1176_v30, 0.0 }
 0x320   : > { %2411 = vpow2.f32 %v1220_v16  ;;  %v3124_v16 = vld [vmem:[%s3313_s2 + $0x3] ss:$0 sm:$0xff] }
 0x323   : > { %v1177_v31 = vpop.f32.mrf.mxu3 }
 0x324   : > { %v1178_v17 = vadd.f32 %v3052_v23, %v1177_v31 }
 0x326   : > { %v1222_v47 = vmul.f32 1.442695, %v1178_v17  ;;  %v2412_v18 = vpop.eup %2411  ;;  %vm1204_vm6 = vcmp.gt.f32.partialorder %v1178_v17, 0.0 }
 0x327   : > { %v2128_v59 = vadd.f32 -1.0, %v2412_v18 }
 0x328   : > { %2413 = vpow2.f32 %v1222_v47 }
 0x329   : > { %v1255_v21 = vsel %vm1203_vm5, %v1176_v30, %v2128_v59 }
 0x32a   : > { %v3093_v1 = vadd.f32 %v1255_v21, %v3022_v41 }
 0x32e   : > { %v2414_v48 = vpop.eup %2413 }
 0x32f   : > { %v2129_v4 = vadd.f32 -1.0, %v2414_v48 }
 0x331   : > { %v1256_v22 = vsel %vm1204_vm6, %v1178_v17, %v2129_v4 }
 0x332   : > { %v3096_v32 = vadd.f32 %v1256_v22, %v3025_v44 }
 0x334   : > { %v1296_v33 = vpack.c.bf16 %v3096_v32, %v3093_v1 }
 0x336   : > { %1368 = vmatmul.bf16.gmra.mxu0 %v1296_v33 }
 0x348   : > { %v1180_v0 = vpop.f32.mrf.mxu3 }
 0x349   : > { %v1181_v34 = vadd.f32 %v3052_v23, %v1180_v0 }
 0x34b   : > { %v1224_v45 = vmul.f32 1.442695, %v1181_v34  ;;  %vm1205_vm7 = vcmp.gt.f32.partialorder %v1181_v34, 0.0 }
 0x34d   : > { %2415 = vpow2.f32 %v1224_v45 }
 0x350   : > { %v1182_v35 = vpop.f32.mrf.mxu3 }
 0x351   : > { %v1183_v36 = vadd.f32 %v3052_v23, %v1182_v35 }
 0x353   : > { %v1226_v27 = vmul.f32 1.442695, %v1183_v36  ;;  %v2416_v41 = vpop.eup %2415  ;;  %vm1206_vm8 = vcmp.gt.f32.partialorder %v1183_v36, 0.0 }
 0x354   : > { %v2130_v44 = vadd.f32 -1.0, %v2416_v41 }
 0x355   : > { %2417 = vpow2.f32 %v1226_v27 }
 0x356   : > { %v1257_v42 = vsel %vm1205_vm7, %v1181_v34, %v2130_v44 }
 0x357   : > { %v3103_v52 = vadd.f32 %v1257_v42, %v3032_v7  ;;  %v2244_v7 = vld [vmem:[#allocation2 + $0x100] sm:$0xff] }
 0x358   : > { %1499 = vmatpush.bf16.msrb.mxu1 %v2244_v7 }
 0x35b   : > { %v2418_v51 = vpop.eup %2417 }
 0x35c   : > { %v2131_v11 = vadd.f32 -1.0, %v2418_v51 }
 0x35e   : > { %v1258_v43 = vsel %vm1206_vm8, %v1183_v36, %v2131_v11 }
 0x35f   : > { %v3106_v24 = vadd.f32 %v1258_v43, %v3035_v63 }
 0x361   : > { %v1297_v53 = vpack.c.bf16 %v3106_v24, %v3103_v52 }
 0x363   : > { %1373 = vmatmul.bf16.gmra.mxu0 %v1297_v53 }
 0x366   : > { %v1185_v55 = vpop.f32.mrf.mxu3 }
 0x367   : > { %v1186_v57 = vadd.f32 %v3052_v23, %v1185_v55 }
 0x369   : > { %v1228_v46 = vmul.f32 1.442695, %v1186_v57  ;;  %vm1207_vm9 = vcmp.gt.f32.partialorder %v1186_v57, 0.0 }
 0x36b   : > { %2419 = vpow2.f32 %v1228_v46 }
 0x36e   : > { %v1187_v60 = vpop.f32.mrf.mxu3 }
 0x36f   : > { %v1188_v63 = vadd.f32 %v3052_v23, %v1187_v60 }
 0x371   : > { %v1230_v56 = vmul.f32 1.442695, %v1188_v63  ;;  %v2420_v28 = vpop.eup %2419  ;;  %vm1208_vm10 = vcmp.gt.f32.partialorder %v1188_v63, 0.0 }
 0x372   : > { %v2132_v61 = vadd.f32 -1.0, %v2420_v28 }
 0x373   : > { %2421 = vpow2.f32 %v1230_v56 }
 0x374   : > { %v1259_v6 = vsel %vm1207_vm9, %v1186_v57, %v2132_v61 }
 0x375   : > { %v3113_v8 = vadd.f32 %v1259_v6, %v3042_v19 }
 0x379   : > { %v2422_v29 = vpop.eup %2421 }
 0x37a   : > { %v2133_v62 = vadd.f32 -1.0, %v2422_v29 }
 0x37c   : > { %v1260_v3 = vsel %vm1208_vm10, %v1188_v63, %v2133_v62 }
 0x37d   : > { %v3116_v58 = vadd.f32 %v1260_v3, %v3045_v20 }
 0x37f   : > { %v1298_v9 = vpack.c.bf16 %v3116_v58, %v3113_v8 }
 0x381   : > { %v1190_v14 = vpop.f32.mrf.mxu3  ;;  %v1359_v15 = vpop.f32.mrf.mxu0  ;;  %1378 = vmatmul.bf16.gmra.mxu0 %v1298_v9 }
 0x382   : > { %v1191_v30 = vadd.f32 %v3052_v23, %v1190_v14  ;;  %v1360_v19 = vadd.f32 %v3124_v16, %v1359_v15 }
 0x384   : > { %v1232_v31 = vmul.f32 1.442695, %v1191_v30  ;;  %v1393_v47 = vmax.f32 %v1360_v19, 0.0  ;;  %vm1209_vm11 = vcmp.gt.f32.partialorder %v1191_v30, 0.0 }
 0x386   : > { %2423 = vpow2.f32 %v1232_v31  ;;  %v1406_v22 = vadd.f32 %v1393_v47, %v3068_v12 }
 0x389   : > { %v1192_v17 = vpop.f32.mrf.mxu3  ;;  %v1361_v20 = vpop.f32.mrf.mxu0 }
 0x38a   : > { %v1193_v18 = vadd.f32 %v3052_v23, %v1192_v17  ;;  %v1362_v59 = vadd.f32 %v3124_v16, %v1361_v20 }
 0x38c   : > { %v1234_v48 = vmul.f32 1.442695, %v1193_v18  ;;  %v1394_v4 = vmax.f32 %v1362_v59, 0.0  ;;  %v2424_v21 = vpop.eup %2423  ;;  %vm1210_vm12 = vcmp.gt.f32.partialorder %v1193_v18, 0.0 }
 0x38d   : > { %v2134_v34 = vadd.f32 -1.0, %v2424_v21 }
 0x38e   : > { %2425 = vpow2.f32 %v1234_v48  ;;  %v1407_v33 = vadd.f32 %v1394_v4, %v3071_v25 }
 0x38f   : > { %v1261_v41 = vsel %vm1209_vm11, %v1191_v30, %v2134_v34 }
 0x390   : > { %v1436_v0 = vpack.c.bf16 %v1407_v33, %v1406_v22  ;;  %v3133_v12 = vadd.f32 %v1261_v41, %v3059_v39 }
 0x391   : > { %v1195_v45 = vpop.f32.mrf.mxu3 }
 0x392   : > { %v1196_v35 = vadd.f32 %v3052_v23, %v1195_v45  ;;  %1500 = vmatmul.bf16.vlgmr.msrb.gmra.mxu1 %v1436_v0 }
 0x394   : > { %v2426_v36 = vpop.eup %2425  ;;  %v1236_v26 = vmul.f32 1.442695, %v1196_v35  ;;  %vm1211_vm13 = vcmp.gt.f32.partialorder %v1196_v35, 0.0 }
 0x395   : > { %v2135_v27 = vadd.f32 -1.0, %v2426_v36 }
 0x396   : > { %2427 = vpow2.f32 %v1236_v26 }
 0x397   : > { %v1262_v50 = vsel %vm1210_vm12, %v1193_v18, %v2135_v27 }
 0x398   : > { %v1364_v44 = vpop.f32.mrf.mxu0  ;;  %v3136_v25 = vadd.f32 %v1262_v50, %v3062_v5 }
 0x399   : > { %v1197_v37 = vpop.f32.mrf.mxu3  ;;  %v1365_v38 = vadd.f32 %v3124_v16, %v1364_v44 }
 0x39a   : > { %v1299_v23 = vpack.c.bf16 %v3136_v25, %v3133_v12 }
 0x39b   : > { %v1395_v43 = vmax.f32 %v1365_v38, 0.0 }
 0x39c   : > { %v2428_v51 = vpop.eup %2427  ;;  %1383 = vmatmul.bf16.gmra.mxu0 %v1299_v23 }
 0x39d   : > { %v2136_v11 = vadd.f32 -1.0, %v2428_v51  ;;  %v1408_v49 = vadd.f32 %v1395_v43, %v3083_v40 }
 0x39f   : > { %v1263_v39 = vsel %vm1211_vm13, %v1196_v35, %v2136_v11 }
 0x3a0   : > { %v1366_v42 = vpop.f32.mrf.mxu0  ;;  %v1276_v55 = vadd.f32 %v1263_v39, %v3077_v2 }
 0x3a1   : > { %v1367_v53 = vadd.f32 %v3124_v16, %v1366_v42 }
 0x3a2   : > { %v1300_v46 = vpack.c.bf16 %v1276_v55, %v1276_v55 }
 0x3a3   : > { %v1396_v54 = vmax.f32 %v1367_v53, 0.0 }
 0x3a5   : > { %v1409_v5 = vadd.f32 %v1396_v54, %v3086_v13 }
 0x3a7   : > { %v1437_v57 = vpack.c.bf16 %v1409_v5, %v1408_v49 }
 0x3a9   : > { %1505 = vmatmul.bf16.gmra.mxu1 %v1437_v57 }
 0x3ac   : > { %1388 = vmatmul.bf16.gmra.mxu0 %v1300_v46 }
 0x3b3   : > { %v1369_v10 = vpop.f32.mrf.mxu0 }
 0x3b4   : > { %v1370_v7 = vadd.f32 %v3124_v16, %v1369_v10 }
 0x3b6   : > { %v1397_v63 = vmax.f32 %v1370_v7, 0.0 }
 0x3b8   : > { %v1410_v61 = vadd.f32 %v1397_v63, %v3093_v1 }
 0x3bb   : > { %v1371_v60 = vpop.f32.mrf.mxu0 }
 0x3bc   : > { %v1372_v56 = vadd.f32 %v3124_v16, %v1371_v60 }
 0x3be   : > { %v1398_v28 = vmax.f32 %v1372_v56, 0.0 }
 0x3c0   : > { %v1411_v40 = vadd.f32 %v1398_v28, %v3096_v32 }
 0x3c2   : > { %v1438_v29 = vpack.c.bf16 %v1411_v40, %v1410_v61 }
 0x3c4   : > { %1510 = vmatmul.bf16.gmra.mxu1 %v1438_v29 }
 0x3e0   : > { %v1374_v13 = vpop.f32.mrf.mxu0 }
 0x3e1   : > { %v1375_v2 = vadd.f32 %v3124_v16, %v1374_v13 }
 0x3e3   : > { %v1399_v6 = vmax.f32 %v1375_v2, 0.0 }
 0x3e5   : > { %v1412_v14 = vadd.f32 %v1399_v6, %v3103_v52  ;;  %v3160_v52 = vld [vmem:[%s3313_s2 + $0x4] ss:$0 sm:$0xff] }
 0x3e8   : > { %v1376_v62 = vpop.f32.mrf.mxu0 }
 0x3e9   : > { %v1377_v3 = vadd.f32 %v3124_v16, %v1376_v62 }
 0x3eb   : > { %v1400_v9 = vmax.f32 %v1377_v3, 0.0 }
 0x3ed   : > { %v1413_v15 = vadd.f32 %v1400_v9, %v3106_v24 }
 0x3ef   : > { %v1439_v30 = vpack.c.bf16 %v1413_v15, %v1412_v14 }
 0x3f1   : > { %1515 = vmatmul.bf16.gmra.mxu1 %v1439_v30 }
 0x3fe   : > { %v1379_v31 = vpop.f32.mrf.mxu0 }
 0x3ff   : > { %v1380_v1 = vadd.f32 %v3124_v16, %v1379_v31 }
 0x401   : > { %v1401_v19 = vmax.f32 %v1380_v1, 0.0 }
 0x403   : > { %v1414_v47 = vadd.f32 %v1401_v19, %v3113_v8 }
 0x406   : > { %v1381_v32 = vpop.f32.mrf.mxu0 }
 0x407   : > { %v1382_v17 = vadd.f32 %v3124_v16, %v1381_v32 }
 0x409   : > { %v1402_v20 = vmax.f32 %v1382_v17, 0.0 }
 0x40b   : > { %v1415_v18 = vadd.f32 %v1402_v20, %v3116_v58 }
 0x40d   : > { %v1440_v24 = vpack.c.bf16 %v1415_v18, %v1414_v47 }
 0x40f   : > { %v1501_v59 = vpop.f32.mrf.mxu1  ;;  %1520 = vmatmul.bf16.gmra.mxu1 %v1440_v24 }
 0x410   : > { %v1502_v48 = vadd.f32 %v3160_v52, %v1501_v59 }
 0x412   : > { %1535 = vmax.xlane.f32.xlu1 %v1502_v48 }
 0x417   : > { %v1503_v4 = vpop.f32.mrf.mxu1 }
 0x418   : > { %v1504_v21 = vadd.f32 %v3160_v52, %v1503_v4 }
 0x419   : > { %v1384_v22 = vpop.f32.mrf.mxu0 }
 0x41a   : > { %1537 = vmax.xlane.f32.xlu2 %v1504_v21  ;;  %v1385_v8 = vadd.f32 %v3124_v16, %v1384_v22 }
 0x41c   : > { %v1403_v58 = vmax.f32 %v1385_v8, 0.0 }
 0x41e   : > { %v1416_v45 = vadd.f32 %v1403_v58, %v3133_v12 }
 0x421   : > { %v1386_v33 = vpop.f32.mrf.mxu0 }
 0x422   : > { %v1387_v0 = vadd.f32 %v3124_v16, %v1386_v33 }
 0x424   : > { %v1404_v34 = vmax.f32 %v1387_v0, 0.0 }
 0x426   : > { %v1417_v35 = vadd.f32 %v1404_v34, %v3136_v25  ;;  %v1506_v36 = vpop.f32.mrf.mxu1 }
 0x427   : > { %v1507_v26 = vadd.f32 %v3160_v52, %v1506_v36 }
 0x428   : > { %v1441_v27 = vpack.c.bf16 %v1417_v35, %v1416_v45 }
 0x429   : > { %v1389_v41 = vpop.f32.mrf.mxu0  ;;  %1539 = vmax.xlane.f32.xlu0 %v1507_v26 }
 0x42a   : > { %1525 = vmatmul.bf16.gmra.mxu1 %v1441_v27  ;;  %v1390_v50 = vadd.f32 %v3124_v16, %v1389_v41 }
 0x42c   : > { %v1405_v23 = vmax.f32 %v1390_v50, 0.0 }
 0x42e   : > { %v1508_v44 = vpop.f32.mrf.mxu1  ;;  %v1418_v38 = vadd.f32 %v1405_v23, %v1276_v55 }
 0x42f   : > { %v1509_v37 = vadd.f32 %v3160_v52, %v1508_v44 }
 0x430   : > { %v1442_v11 = vpack.c.bf16 %v1418_v38, %v1418_v38 }
 0x431   : > { %v1391_v51 = vpop.f32.mrf.mxu0  ;;  %1541 = vmax.xlane.f32.xlu2 %v1509_v37 }
 0x43a   : > { %1530 = vmatmul.bf16.gmra.mxu1 %v1442_v11 }
 0x441   : > { %v1511_v12 = vpop.f32.mrf.mxu1 }
 0x442   : > { %v1512_v25 = vadd.f32 %v3160_v52, %v1511_v12 }
 0x444   : > { %1543 = vmax.xlane.f32.xlu1 %v1512_v25 }
 0x449   : > { %v1513_v42 = vpop.f32.mrf.mxu1 }
 0x44a   : > { %v1514_v43 = vadd.f32 %v3160_v52, %v1513_v42 }
 0x44c   : > { %1545 = vmax.xlane.f32.xlu2 %v1514_v43 }
 0x46e   : > { %v1516_v53 = vpop.f32.mrf.mxu1 }
 0x46f   : > { %v1517_v16 = vadd.f32 %v3160_v52, %v1516_v53 }
 0x471   : > { %1547 = vmax.xlane.f32.xlu0 %v1517_v16 }
 0x476   : > { %v1518_v54 = vpop.f32.mrf.mxu1 }
 0x477   : > { %v1519_v39 = vadd.f32 %v3160_v52, %v1518_v54 }
 0x479   : > { %1549 = vmax.xlane.f32.xlu1 %v1519_v39 }
 0x485   : > { %v1536_v46 = vpop.xlane.xlu1 %1535 }
 0x486   : > { %v1561_v7 = vsub.f32 %v1502_v48, %v1536_v46 }
 0x488   : > { %v1574_v60 = vmul.f32 1.442695, %v1561_v7 }
 0x48a   : > { %2429 = vpow2.f32 %v1574_v60 }
 0x48c   : > { %v1521_v49 = vpop.f32.mrf.mxu1 }
 0x48d   : > { %v3176_v5 = vadd.f32 %v3160_v52, %v1521_v49  ;;  %v1538_v10 = vpop.xlane.xlu2 %1537 }
 0x48e   : > { %v1562_v61 = vsub.f32 %v1504_v21, %v1538_v10 }
 0x48f   : > { %1551 = vmax.xlane.f32.xlu2 %v3176_v5 }
 0x490   : > { %v1576_v29 = vmul.f32 1.442695, %v1562_v61  ;;  %v3190_v3 = vpop.eup %2429 }
 0x492   : > { %2431 = vpow2.f32 %v1576_v29 }
 0x494   : > { %v1523_v55 = vpop.f32.mrf.mxu1 }
 0x495   : > { %v3180_v57 = vadd.f32 %v3160_v52, %v1523_v55 }
 0x497   : > { %1553 = vmax.xlane.f32.xlu0 %v3180_v57 }
 0x498   : > { %v3197_v32 = vpop.eup %2431 }
 0x49c   : > { %v1540_v2 = vpop.xlane.xlu0 %1539 }
 0x49d   : > { %v1563_v9 = vsub.f32 %v1507_v26, %v1540_v2 }
 0x49f   : > { %v1578_v14 = vmul.f32 1.442695, %v1563_v9 }
 0x4a4   : > { %v1542_v28 = vpop.xlane.xlu2 %1541 }
 0x4a5   : > { %v1564_v40 = vsub.f32 %v1509_v37, %v1542_v28 }
 0x4a7   : > { %v1526_v63 = vpop.f32.mrf.mxu1  ;;  %v1580_v62 = vmul.f32 1.442695, %v1564_v40 }
 0x4a8   : > { %v3184_v56 = vadd.f32 %v3160_v52, %v1526_v63 }
 0x4a9   : > { %2433 = vpow2.f32 %v1580_v62 }
 0x4aa   : > { %1555 = vmax.xlane.f32.xlu1 %v3184_v56  ;;  %2435 = vpow2.f32 %v1578_v14 }
 0x4af   : > { %v1528_v13 = vpop.f32.mrf.mxu1  ;;  %v3199_v19 = vpop.eup %2433 }
 0x4b0   : > { %v3188_v6 = vadd.f32 %v3160_v52, %v1528_v13  ;;  %v3204_v24 = vpop.eup %2435 }
 0x4b2   : > { %1557 = vmax.xlane.f32.xlu2 %v3188_v6  ;;  %1600 = vadd.xlane.f32.xlu1 %v3190_v3 }
 0x4b7   : > { %v1531_v15 = vpop.f32.mrf.mxu1  ;;  %v1544_v30 = vpop.xlane.xlu1 %1543 }
 0x4b8   : > { %v3195_v31 = vadd.f32 %v3160_v52, %v1531_v15  ;;  %v1565_v1 = vsub.f32 %v1512_v25, %v1544_v30 }
 0x4ba   : > { %v1582_v17 = vmul.f32 1.442695, %v1565_v1  ;;  %1559 = vmax.xlane.f32.xlu0 %v3195_v31  ;;  %1602 = vadd.xlane.f32.xlu2 %v3197_v32 }
 0x4bb   : > { %1606 = vadd.xlane.f32.xlu1 %v3199_v19 }
 0x4bc   : > { %2437 = vpow2.f32 %v1582_v17 }
 0x4bf   : > { %v1533_v20 = vpop.f32.mrf.mxu1  ;;  %v1546_v47 = vpop.xlane.xlu2 %1545 }
 0x4c0   : > { %v1566_v18 = vsub.f32 %v1514_v43, %v1546_v47 }
 0x4c2   : > { %v3206_v52 = vpop.eup %2437  ;;  %v1584_v59 = vmul.f32 1.442695, %v1566_v18  ;;  %1604 = vadd.xlane.f32.xlu0 %v3204_v24 }
 0x4c3   : > { %1608 = vadd.xlane.f32.xlu2 %v3206_v52 }
 0x4c4   : > { %2439 = vpow2.f32 %v1584_v59 }
 0x4ca   : > { %v3210_v48 = vpop.eup %2439 }
 0x4cb   : > { %1610 = vadd.xlane.f32.xlu0 %v3210_v48 }
 0x4e4   : > { %v1548_v4 = vpop.xlane.xlu0 %1547 }
 0x4e5   : > { %v1567_v21 = vsub.f32 %v1517_v16, %v1548_v4 }
 0x4e7   : > { %v1586_v22 = vmul.f32 1.442695, %v1567_v21 }
 0x4e9   : > { %2441 = vpow2.f32 %v1586_v22 }
 0x4ec   : > { %v1550_v8 = vpop.xlane.xlu1 %1549 }
 0x4ed   : > { %v1568_v33 = vsub.f32 %v1519_v39, %v1550_v8 }
 0x4ef   : > { %v3213_v58 = vpop.eup %2441  ;;  %v1588_v0 = vmul.f32 1.442695, %v1568_v33 }
 0x4f0   : > { %1612 = vadd.xlane.f32.xlu1 %v3213_v58 }
 0x4f1   : > { %2443 = vpow2.f32 %v1588_v0 }
 0x4f7   : > { %v3216_v34 = vpop.eup %2443 }
 0x4f8   : > { %1614 = vadd.xlane.f32.xlu2 %v3216_v34 }
 0x502   : > { %v1552_v45 = vpop.xlane.xlu2 %1551 }
 0x503   : > { %v1569_v35 = vsub.f32 %v3176_v5, %v1552_v45 }
 0x505   : > { %v1590_v36 = vmul.f32 1.442695, %v1569_v35 }
 0x507   : > { %2445 = vpow2.f32 %v1590_v36 }
 0x50a   : > { %v1554_v26 = vpop.xlane.xlu0 %1553 }
 0x50b   : > { %v1570_v27 = vsub.f32 %v3180_v57, %v1554_v26 }
 0x50d   : > { %v3221_v41 = vpop.eup %2445  ;;  %v1592_v50 = vmul.f32 1.442695, %v1570_v27 }
 0x50e   : > { %1616 = vadd.xlane.f32.xlu0 %v3221_v41 }
 0x50f   : > { %2447 = vpow2.f32 %v1592_v50 }
 0x515   : > { %v3224_v44 = vpop.eup %2447 }
 0x516   : > { %1618 = vadd.xlane.f32.xlu1 %v3224_v44 }
 0x51d   : > { %v1556_v37 = vpop.xlane.xlu1 %1555 }
 0x51e   : > { %v1571_v23 = vsub.f32 %v3184_v56, %v1556_v37 }
 0x520   : > { %v1594_v51 = vmul.f32 1.442695, %v1571_v23 }
 0x522   : > { %2449 = vpow2.f32 %v1594_v51 }
 0x525   : > { %v1558_v38 = vpop.xlane.xlu2 %1557  ;;  %v1601_v11 = vpop.xlane.xlu1 %1600 }
 0x526   : > { %v1572_v12 = vsub.f32 %v3188_v6, %v1558_v38  ;;  %2451 = vrcp.f32 %v1601_v11  ;;  %v1637_v57 = vand.u32 2147483648, %v1601_v11  ;;  %v1635_v7 = vand.u32 2147483647, %v1601_v11 }
 0x527   : > { %vm1631_vm15 = vweird.f32 %v1601_v11 }
 0x528   : > { %v3229_v25 = vpop.eup %2449  ;;  %v1596_v42 = vmul.f32 1.442695, %v1572_v12  ;;  %v1638_v56 = vor.u32 1.1754944e-38, %v1637_v57  ;;  %vm1636_vm1 = vcmp.eq.f32.partialorder %v1635_v7, 8.507059e+37 }
 0x529   : > { %1620 = vadd.xlane.f32.xlu2 %v3229_v25 }
 0x52a   : > { %2453 = vpow2.f32 %v1596_v42 }
 0x52c   : > { %v2452_v43 = vpop.eup %2451 }
 0x52d   : > { %v1627_v53 = vmul.f32 %v2452_v43, %v1601_v11  ;;  %v1560_v16 = vpop.xlane.xlu0 %1559  ;;  %v1603_v54 = vpop.xlane.xlu2 %1602  ;;  %vm1632_vm14 = vweird.f32 %v2452_v43 }
 0x52e   : > { %v1573_v39 = vsub.f32 %v3195_v31, %v1560_v16  ;;  %2455 = vrcp.f32 %v1603_v54  ;;  %v1607_v49 = vpop.xlane.xlu1 %1606  ;;  %vm1633_vm0 = vmor %vm1631_vm15, %vm1632_vm14  ;;  %v1652_v15 = vand.u32 2147483648, %v1603_v54  ;;  %v1650_v1 = vand.u32 2147483647, %v1603_v54 }
 0x52f   : > { %v1628_v5 = vsub.f32 1.0, %v1627_v53  ;;  %2457 = vrcp.f32 %v1607_v49  ;;  %v1682_v17 = vand.u32 2147483648, %v1607_v49  ;;  %vm1646_vm4 = vweird.f32 %v1603_v54 }
 0x530   : > { %v3234_v55 = vpop.eup %2453  ;;  %v1598_v46 = vmul.f32 1.442695, %v1573_v39  ;;  %v1653_v59 = vor.u32 1.1754944e-38, %v1652_v15  ;;  %vm1676_vm6 = vweird.f32 %v1607_v49  ;;  %vm1651_vm7 = vcmp.eq.f32.partialorder %v1650_v1, 8.507059e+37 }
 0x531   : > { %v1629_v10 = vmul.f32 %v2452_v43, %v1628_v5  ;;  %1622 = vadd.xlane.f32.xlu0 %v3234_v55  ;;  %v1683_v22 = vor.u32 1.1754944e-38, %v1682_v17 }
 0x532   : > { %2459 = vpow2.f32 %v1598_v46 }
 0x533   : > { %v1630_v60 = vadd.f32 %v2452_v43, %v1629_v10 }
 0x534   : > { %v2456_v63 = vpop.eup %2455 }
 0x535   : > { %v2458_v28 = vpop.eup %2457  ;;  %v1634_v61 = vsel %vm1633_vm0, %v2452_v43, %v1630_v60  ;;  %v1642_v40 = vmul.f32 %v2456_v63, %v1603_v54  ;;  %v1605_v29 = vpop.xlane.xlu0 %1604  ;;  %vm1647_vm2 = vweird.f32 %v2456_v63 }
 0x536   : > { %v1639_v13 = vsel %vm1636_vm1, %v1638_v56, %v1634_v61  ;;  %v1672_v2 = vmul.f32 %v2458_v28, %v1607_v49  ;;  %2461 = vrcp.f32 %v1605_v29  ;;  %v3239_v62 = vpop.xlane.xlu2 %1608  ;;  %vm1677_vm3 = vweird.f32 %v2458_v28  ;;  %vm1648_vm5 = vmor %vm1646_vm4, %vm1647_vm2 }
 0x537   : > { %v1640_v6 = vmul.f32 %v3190_v3, %v1639_v13  ;;  %v1643_v9 = vsub.f32 1.0, %v1642_v40  ;;  %2463 = vrcp.f32 %v3239_v62  ;;  %v1680_v3 = vand.u32 2147483647, %v1607_v49  ;;  %vm1678_vm8 = vmor %vm1676_vm6, %vm1677_vm3 }
 0x538   : > { %v3242_v14 = vpop.eup %2459  ;;  %v1673_v30 = vsub.f32 1.0, %v1672_v2  ;;  %v1667_v23 = vand.u32 2147483648, %v1605_v29  ;;  %v1665_v38 = vand.u32 2147483647, %v1605_v29  ;;  %vm1661_vm11 = vweird.f32 %v1605_v29 }
 0x539   : > { %1821 = vst [vmem:[%s3245_s30] sm:$0xff] %v1640_v6  ;;  %v1644_v31 = vmul.f32 %v2456_v63, %v1643_v9  ;;  %1624 = vadd.xlane.f32.xlu1 %v3242_v14  ;;  %vm1681_vm9 = vcmp.eq.f32.partialorder %v1680_v3, 8.507059e+37  ;;  %v1697_v12 = vand.u32 2147483648, %v3239_v62  ;;  %vm1691_vm15 = vweird.f32 %v3239_v62 }
 0x53a   : > { %v1674_v20 = vmul.f32 %v2458_v28, %v1673_v30  ;;  %v1668_v53 = vor.u32 1.1754944e-38, %v1667_v23  ;;  %vm1666_vm14 = vcmp.eq.f32.partialorder %v1665_v38, 8.507059e+37 }
 0x53b   : > { %v1645_v47 = vadd.f32 %v2456_v63, %v1644_v31  ;;  %v1698_v49 = vor.u32 1.1754944e-38, %v1697_v12 }
 0x53c   : > { %v2462_v18 = vpop.eup %2461  ;;  %v1675_v4 = vadd.f32 %v2458_v28, %v1674_v20 }
 0x53d   : > { %v1649_v21 = vsel %vm1648_vm5, %v2456_v63, %v1645_v47  ;;  %v1657_v8 = vmul.f32 %v2462_v18, %v1605_v29  ;;  %v2464_v33 = vpop.eup %2463  ;;  %vm1662_vm10 = vweird.f32 %v2462_v18 }
 0x53e   : > { %v1654_v0 = vsel %vm1651_vm7, %v1653_v59, %v1649_v21  ;;  %v1679_v45 = vsel %vm1678_vm8, %v2458_v28, %v1675_v4  ;;  %v1611_v35 = vpop.xlane.xlu0 %1610  ;;  %v1687_v50 = vmul.f32 %v2464_v33, %v3239_v62  ;;  %vm1692_vm12 = vweird.f32 %v2464_v33  ;;  %vm1663_vm13 = vmor %vm1661_vm11, %vm1662_vm10 }
 0x53f   : > { %v1655_v36 = vmul.f32 %v3197_v32, %v1654_v0  ;;  %v1684_v26 = vsel %vm1681_vm9, %v1683_v22, %v1679_v45  ;;  %v1658_v27 = vsub.f32 1.0, %v1657_v8  ;;  %2465 = vrcp.f32 %v1611_v35  ;;  %vm1693_vm0 = vmor %vm1691_vm15, %vm1692_vm12 }
 0x540   : > { %v1685_v37 = vmul.f32 %v3199_v19, %v1684_v26  ;;  %v1688_v11 = vsub.f32 1.0, %v1687_v50  ;;  %v1695_v32 = vand.u32 2147483647, %v3239_v62  ;;  %v1712_v63 = vand.u32 2147483648, %v1611_v35 }
 0x541   : > { %1822 = vst [vmem:[%s3245_s30 + $0x8] sm:$0xff] %v1655_v36  ;;  %v1659_v51 = vmul.f32 %v2462_v18, %v1658_v27  ;;  %v1710_v28 = vand.u32 2147483647, %v1611_v35  ;;  %vm1706_vm3 = vweird.f32 %v1611_v35 }
 0x542   : > { %1824 = vst [vmem:[%s3245_s30 + $0x18] sm:$0xff] %v1685_v37  ;;  %v1689_v43 = vmul.f32 %v2464_v33, %v1688_v11  ;;  %vm1696_vm1 = vcmp.eq.f32.partialorder %v1695_v32, 8.507059e+37  ;;  %v1713_v40 = vor.u32 1.1754944e-38, %v1712_v63 }
 0x543   : > { %v1660_v42 = vadd.f32 %v2462_v18, %v1659_v51  ;;  %vm1711_vm5 = vcmp.eq.f32.partialorder %v1710_v28, 8.507059e+37 }
 0x544   : > { %v1690_v16 = vadd.f32 %v2464_v33, %v1689_v43 }
 0x545   : > { %v1664_v19 = vsel %vm1663_vm13, %v2462_v18, %v1660_v42  ;;  %v2466_v54 = vpop.eup %2465 }
 0x546   : > { %v1669_v39 = vsel %vm1666_vm14, %v1668_v53, %v1664_v19  ;;  %v1694_v57 = vsel %vm1693_vm0, %v2464_v33, %v1690_v16  ;;  %v1702_v46 = vmul.f32 %v2466_v54, %v1611_v35  ;;  %vm1707_vm2 = vweird.f32 %v2466_v54 }
 0x547   : > { %v1670_v5 = vmul.f32 %v3204_v24, %v1669_v39  ;;  %v1699_v10 = vsel %vm1696_vm1, %v1698_v49, %v1694_v57  ;;  %vm1708_vm4 = vmor %vm1706_vm3, %vm1707_vm2 }
 0x548   : > { %v1700_v7 = vmul.f32 %v3206_v52, %v1699_v10  ;;  %v1703_v60 = vsub.f32 1.0, %v1702_v46 }
 0x549   : > { %1823 = vst [vmem:[%s3245_s30 + $0x10] sm:$0xff] %v1670_v5 }
 0x54a   : > { %1825 = vst [vmem:[%s3245_s30 + $0x20] sm:$0xff] %v1700_v7  ;;  %v1704_v56 = vmul.f32 %v2466_v54, %v1703_v60 }
 0x54c   : > { %v1705_v61 = vadd.f32 %v2466_v54, %v1704_v56 }
 0x54e   : > { %v1709_v29 = vsel %vm1708_vm4, %v2466_v54, %v1705_v61 }
 0x54f   : > { %v1714_v24 = vsel %vm1711_vm5, %v1713_v40, %v1709_v29 }
 0x550   : > { %v1715_v13 = vmul.f32 %v3210_v48, %v1714_v24 }
 0x552   : > { %1826 = vst [vmem:[%s3245_s30 + $0x28] sm:$0xff] %v1715_v13 }
 0x563   : > { %v1613_v2 = vpop.xlane.xlu1 %1612 }
 0x564   : > { %2467 = vrcp.f32 %v1613_v2  ;;  %v1727_v15 = vand.u32 2147483648, %v1613_v2  ;;  %v1725_v31 = vand.u32 2147483647, %v1613_v2  ;;  %vm1721_vm7 = vweird.f32 %v1613_v2 }
 0x566   : > { %v1728_v20 = vor.u32 1.1754944e-38, %v1727_v15  ;;  %vm1726_vm9 = vcmp.eq.f32.partialorder %v1725_v31, 8.507059e+37 }
 0x56a   : > { %v2468_v62 = vpop.eup %2467 }
 0x56b   : > { %v1717_v52 = vmul.f32 %v2468_v62, %v1613_v2  ;;  %v1615_v6 = vpop.xlane.xlu2 %1614  ;;  %vm1722_vm6 = vweird.f32 %v2468_v62 }
 0x56c   : > { %2469 = vrcp.f32 %v1615_v6  ;;  %vm1723_vm8 = vmor %vm1721_vm7, %vm1722_vm6  ;;  %v1742_v4 = vand.u32 2147483648, %v1615_v6  ;;  %v1740_v22 = vand.u32 2147483647, %v1615_v6  ;;  %vm1736_vm11 = vweird.f32 %v1615_v6 }
 0x56d   : > { %v1718_v9 = vsub.f32 1.0, %v1717_v52 }
 0x56e   : > { %v1743_v33 = vor.u32 1.1754944e-38, %v1742_v4  ;;  %vm1741_vm13 = vcmp.eq.f32.partialorder %v1740_v22, 8.507059e+37 }
 0x56f   : > { %v1719_v30 = vmul.f32 %v2468_v62, %v1718_v9 }
 0x571   : > { %v1720_v1 = vadd.f32 %v2468_v62, %v1719_v30 }
 0x572   : > { %v2470_v17 = vpop.eup %2469 }
 0x573   : > { %v1724_v3 = vsel %vm1723_vm8, %v2468_v62, %v1720_v1  ;;  %v1732_v48 = vmul.f32 %v2470_v17, %v1615_v6  ;;  %vm1737_vm10 = vweird.f32 %v2470_v17 }
 0x574   : > { %v1729_v47 = vsel %vm1726_vm9, %v1728_v20, %v1724_v3  ;;  %vm1738_vm12 = vmor %vm1736_vm11, %vm1737_vm10 }
 0x575   : > { %v1730_v18 = vmul.f32 %v3213_v58, %v1729_v47  ;;  %v1733_v59 = vsub.f32 1.0, %v1732_v48 }
 0x577   : > { %1827 = vst [vmem:[%s3245_s30 + $0x30] sm:$0xff] %v1730_v18  ;;  %v1734_v21 = vmul.f32 %v2470_v17, %v1733_v59 }
 0x579   : > { %v1735_v8 = vadd.f32 %v2470_v17, %v1734_v21 }
 0x57b   : > { %v1739_v0 = vsel %vm1738_vm12, %v2470_v17, %v1735_v8 }
 0x57c   : > { %v1744_v45 = vsel %vm1741_vm13, %v1743_v33, %v1739_v0 }
 0x57d   : > { %v1745_v35 = vmul.f32 %v3216_v34, %v1744_v45 }
 0x57f   : > { %1828 = vst [vmem:[%s3245_s30 + $0x38] sm:$0xff] %v1745_v35 }
 0x581   : > { %v1617_v36 = vpop.xlane.xlu0 %1616 }
 0x582   : > { %2471 = vrcp.f32 %v1617_v36  ;;  %v1757_v37 = vand.u32 2147483648, %v1617_v36  ;;  %v1755_v51 = vand.u32 2147483647, %v1617_v36  ;;  %vm1751_vm15 = vweird.f32 %v1617_v36 }
 0x584   : > { %v1758_v12 = vor.u32 1.1754944e-38, %v1757_v37  ;;  %vm1756_vm1 = vcmp.eq.f32.partialorder %v1755_v51, 8.507059e+37 }
 0x588   : > { %v2472_v26 = vpop.eup %2471 }
 0x589   : > { %v1747_v58 = vmul.f32 %v2472_v26, %v1617_v36  ;;  %v1619_v27 = vpop.xlane.xlu1 %1618  ;;  %vm1752_vm14 = vweird.f32 %v2472_v26 }
 0x58a   : > { %2473 = vrcp.f32 %v1619_v27  ;;  %vm1753_vm0 = vmor %vm1751_vm15, %vm1752_vm14  ;;  %v1772_v19 = vand.u32 2147483648, %v1619_v27  ;;  %v1770_v54 = vand.u32 2147483647, %v1619_v27  ;;  %vm1766_vm3 = vweird.f32 %v1619_v27 }
 0x58b   : > { %v1748_v50 = vsub.f32 1.0, %v1747_v58 }
 0x58c   : > { %v1773_v49 = vor.u32 1.1754944e-38, %v1772_v19  ;;  %vm1771_vm5 = vcmp.eq.f32.partialorder %v1770_v54, 8.507059e+37 }
 0x58d   : > { %v1749_v23 = vmul.f32 %v2472_v26, %v1748_v50 }
 0x58f   : > { %v1750_v38 = vadd.f32 %v2472_v26, %v1749_v23 }
 0x590   : > { %v2474_v11 = vpop.eup %2473 }
 0x591   : > { %v1754_v42 = vsel %vm1753_vm0, %v2472_v26, %v1750_v38  ;;  %v1762_v34 = vmul.f32 %v2474_v11, %v1619_v27  ;;  %vm1767_vm2 = vweird.f32 %v2474_v11 }
 0x592   : > { %v1759_v43 = vsel %vm1756_vm1, %v1758_v12, %v1754_v42  ;;  %vm1768_vm4 = vmor %vm1766_vm3, %vm1767_vm2 }
 0x593   : > { %v1760_v32 = vmul.f32 %v3221_v41, %v1759_v43  ;;  %v1763_v53 = vsub.f32 1.0, %v1762_v34 }
 0x595   : > { %1829 = vst [vmem:[%s3245_s30 + $0x40] sm:$0xff] %v1760_v32  ;;  %v1764_v16 = vmul.f32 %v2474_v11, %v1763_v53 }
 0x597   : > { %v1765_v39 = vadd.f32 %v2474_v11, %v1764_v16 }
 0x599   : > { %v1769_v5 = vsel %vm1768_vm4, %v2474_v11, %v1765_v39 }
 0x59a   : > { %v1774_v57 = vsel %vm1771_vm5, %v1773_v49, %v1769_v5 }
 0x59b   : > { %v1775_v46 = vmul.f32 %v3224_v44, %v1774_v57 }
 0x59c   : > { %v1621_v10 = vpop.xlane.xlu2 %1620 }
 0x59d   : > { %1830 = vst [vmem:[%s3245_s30 + $0x48] sm:$0xff] %v1775_v46  ;;  %2475 = vrcp.f32 %v1621_v10  ;;  %v1787_v56 = vand.u32 2147483648, %v1621_v10  ;;  %v1785_v61 = vand.u32 2147483647, %v1621_v10  ;;  %vm1781_vm7 = vweird.f32 %v1621_v10 }
 0x59f   : > { %v1788_v24 = vor.u32 1.1754944e-38, %v1787_v56  ;;  %vm1786_vm9 = vcmp.eq.f32.partialorder %v1785_v61, 8.507059e+37 }
 0x5a3   : > { %v2476_v41 = vpop.eup %2475 }
 0x5a4   : > { %v1777_v7 = vmul.f32 %v2476_v41, %v1621_v10  ;;  %v1623_v60 = vpop.xlane.xlu0 %1622  ;;  %vm1782_vm6 = vweird.f32 %v2476_v41 }
 0x5a5   : > { %2477 = vrcp.f32 %v1623_v60  ;;  %vm1783_vm8 = vmor %vm1781_vm7, %vm1782_vm6  ;;  %v1802_v9 = vand.u32 2147483648, %v1623_v60  ;;  %v1800_v30 = vand.u32 2147483647, %v1623_v60  ;;  %vm1796_vm11 = vweird.f32 %v1623_v60 }
 0x5a6   : > { %v1778_v63 = vsub.f32 1.0, %v1777_v7 }
 0x5a7   : > { %v1803_v17 = vor.u32 1.1754944e-38, %v1802_v9  ;;  %vm1801_vm13 = vcmp.eq.f32.partialorder %v1800_v30, 8.507059e+37 }
 0x5a8   : > { %v1779_v28 = vmul.f32 %v2476_v41, %v1778_v63 }
 0x5aa   : > { %v1780_v40 = vadd.f32 %v2476_v41, %v1779_v28 }
 0x5ab   : > { %v2478_v29 = vpop.eup %2477 }
 0x5ac   : > { %v1784_v13 = vsel %vm1783_vm8, %v2476_v41, %v1780_v40  ;;  %v1792_v44 = vmul.f32 %v2478_v29, %v1623_v60  ;;  %v1625_v2 = vpop.xlane.xlu1 %1624  ;;  %vm1797_vm10 = vweird.f32 %v2478_v29 }
 0x5ad   : > { %v1789_v62 = vsel %vm1786_vm9, %v1788_v24, %v1784_v13  ;;  %2479 = vrcp.f32 %v1625_v2  ;;  %vm1798_vm12 = vmor %vm1796_vm11, %vm1797_vm10  ;;  %v1817_v18 = vand.u32 2147483648, %v1625_v2  ;;  %v1815_v4 = vand.u32 2147483647, %v1625_v2 }
 0x5ae   : > { %v1790_v52 = vmul.f32 %v3229_v25, %v1789_v62  ;;  %v1793_v6 = vsub.f32 1.0, %v1792_v44  ;;  %vm1811_vm15 = vweird.f32 %v1625_v2 }
 0x5af   : > { %v1818_v22 = vor.u32 1.1754944e-38, %v1817_v18  ;;  %vm1816_vm1 = vcmp.eq.f32.partialorder %v1815_v4, 8.507059e+37 }
 0x5b0   : > { %1831 = vst [vmem:[%s3245_s30 + $0x50] sm:$0xff] %v1790_v52  ;;  %v1794_v15 = vmul.f32 %v2478_v29, %v1793_v6 }
 0x5b2   : > { %v1795_v31 = vadd.f32 %v2478_v29, %v1794_v15 }
 0x5b3   : > { %v2480_v1 = vpop.eup %2479 }
 0x5b4   : > { %v1799_v20 = vsel %vm1798_vm12, %v2478_v29, %v1795_v31  ;;  %v1807_v3 = vmul.f32 %v2480_v1, %v1625_v2  ;;  %vm1812_vm14 = vweird.f32 %v2480_v1 }
 0x5b5   : > { %v1804_v48 = vsel %vm1801_vm13, %v1803_v17, %v1799_v20  ;;  %vm1813_vm0 = vmor %vm1811_vm15, %vm1812_vm14 }
 0x5b6   : > { %v1805_v25 = vmul.f32 %v3234_v55, %v1804_v48  ;;  %v1808_v47 = vsub.f32 1.0, %v1807_v3 }
 0x5b8   : > { %1832 = vst [vmem:[%s3245_s30 + $0x58] sm:$0xff] %v1805_v25  ;;  %v1809_v59 = vmul.f32 %v2480_v1, %v1808_v47 }
 0x5ba   : > { %v1810_v21 = vadd.f32 %v2480_v1, %v1809_v59 }
 0x5bc   : > { %v1814_v55 = vsel %vm1813_vm0, %v2480_v1, %v1810_v21 }
 0x5bd   : > { %v1819_v8 = vsel %vm1816_vm1, %v1818_v22, %v1814_v55 }
 0x5be   : > { %v1820_v33 = vmul.f32 %v3242_v14, %v1819_v8 }
 0x5c0   : > { %1833 = vst [vmem:[%s3245_s30 + $0x60] sm:$0xff] %v1820_v33 }
 0x5c1   : > { %2538 = shalt.err (!%p2535_p8)
}
 0x5c2   : > { %s2587_s26 = smov 128   ;;  %s2588_s27 = smov 8  }
 0x5c3   : > { %2274 = dma.vmem_to_hbm [thread:$0]  (%p2647_p5), %s1848_s16, 1664, %s1850_s8, %s1835_s9, %s2587_s26, %s2587_s26, %s2588_s27  }
 0x5c4 PF: > { %p2286_p9 = scmp.ge.s32.totalorder %s2577_s15, 2  ;;  %s1864_s28 = sand.u32 1, %s2565_s12  }
 0x5c5   : > { %s1865_s29 = scalar_lea.sflag [#allocation4], %s1864_s28 }
 0x5c6   : > { %p2281_p10 = pnand %p2286_p9, %p2651_p6 }
 0x5c8   : > { %p2282_p11 = pneg %p2281_p10 }
 0x5ca   : > { %2560 = dma.done.wait (%p2282_p11), %s1865_s29, 1664  }
 0x5cb   : > { %2562 = vsyncadd (%p2282_p11), %s1865_s29, 4294965632  ;;  %p14_p12 = scmp.ge.s32.totalorder %s2634_s18, 4   ;;  %s3317_s12 = smov %s2569_s13 }
 0x5cc   : > { %s3318_s13 = smov %s2573_s14  ;;  %s3319_s14 = smov %s2645_s21 }
 0x5cd   : > { %s3320_s15 = smov %s2634_s18  ;;  %16 = sbr.rel (!%p14_p12) target bundleno = 4 (0x4), region = 72 }
 0x5d2   :  { %1871 = vsyncpa [#allocation3], 1 }
 0x5d3   :  { %1873 = vsyncpa [#allocation3 + $0x1], 1 }
 0x5d4   :  { %1874 = vsyncpa [#allocation4], 1 }
 0x5d5   :  { %1876 = vsyncpa [#allocation4 + $0x1], 1 }

</bundles_post_ra>
